<compile_context>
chip_gen: v7x
topology: tpu7x:2x2x1
jax: 0.10.0
libtpu: 0.0.40
codegen_flags: <defaults>
</compile_context>

<pallas_src>
import functools

import numpy as np

import jax
import jax.numpy as jnp
from jax import lax
from jax.experimental import pallas as pl
from jax.experimental.pallas import tpu as pltpu


def _cn_fused_kernel(x_ref, w1_ref, b1_ref, w2_ref, b2_ref, wfc_ref, bfc_ref,
                     o_ref, pad1_ref, pad2_ref,
                     *, NB, H, W, C_in, C1, C2, KH, OFF, O_PAD):
    """Fused CN forward for one batch block of NB images (fused W*C lane layout)."""
    P = (KH - 1) // 2
    H2, W2, H4 = H // 2, W // 2, H // 4
    L1 = W * C1            # layer-1 conv output lanes (x, c) fused
    L1P = L1 - C1          # after the overlapped-slice W-pool
    L2 = W2 * C2
    L2P = L2 - C2

    # ---- zero only the H halos (P rows top / bottom); the interiors are fully
    # ---- overwritten every grid step (safe under megacore grid splitting).
    pad1_ref[:, OFF - P:OFF, :] = jnp.zeros((NB, P, W * C_in), jnp.float32)
    pad1_ref[:, OFF + H:OFF + H + P, :] = jnp.zeros((NB, P, W * C_in), jnp.float32)
    pad2_ref[:, OFF - P:OFF, :] = jnp.zeros((NB, P, L1P), jnp.float32)
    pad2_ref[:, OFF + H2:OFF + H2 + P, :] = jnp.zeros((NB, P, L1P), jnp.float32)

    # ---- stage the input block into the padded slab (8-aligned interior). ----
    pad1_ref[:, OFF:OFF + H, :] = x_ref[...]

    # ---- layer 1: conv 5x5 'same' as KH banded matmuls + bias + ReLU. ----
    y = jnp.zeros((NB * H, L1), jnp.float32)
    for dy in range(KH):
        r0 = OFF - P + dy
        lhs = pad1_ref[:, r0:r0 + H, :].reshape(NB * H, W * C_in)
        y = y + jnp.dot(lhs, w1_ref[dy], preferred_element_type=jnp.float32)
    y = jnp.maximum(y + b1_ref[...], 0.0)                     # (NB*H, W*C1)

    # ---- 2x2/2 maxpool.  W: overlapped lane slices (valid at even-x blocks). ----
    yw = jnp.maximum(y[:, :L1P], y[:, C1:])                   # (NB*H, L1P)
    # ---- H: max of adjacent row pairs, written straight into the layer-2 slab.
    ywr = yw.reshape(NB, H, L1P)
    for h2 in range(H2):
        pad2_ref[:, OFF + h2, :] = jnp.maximum(ywr[:, 2 * h2, :],
                                               ywr[:, 2 * h2 + 1, :])

    # ---- layer 2: conv 5x5 'same'; banded weights read only even-x lane blocks.
    y2 = jnp.zeros((NB * H2, L2), jnp.float32)
    for dy in range(KH):
        r0 = OFF - P + dy
        lhs = pad2_ref[:, r0:r0 + H2, :].reshape(NB * H2, L1P)
        y2 = y2 + jnp.dot(lhs, w2_ref[dy], preferred_element_type=jnp.float32)
    y2 = jnp.maximum(y2 + b2_ref[...], 0.0)                   # (NB*H2, W2*C2)

    yw2 = jnp.maximum(y2[:, :L2P], y2[:, C2:])                # W-pool
    yw2r = yw2.reshape(NB, H2, L2P)

    # ---- H-pool of layer 2 fused with the fc matmul (lane-dense 128-col out). ----
    acc = jnp.zeros((NB, O_PAD), jnp.float32)
    for h4 in range(H4):
        p = jnp.maximum(yw2r[:, 2 * h4, :], yw2r[:, 2 * h4 + 1, :])   # (NB, L2P)
        acc = acc + jnp.dot(p, wfc_ref[h4], preferred_element_type=jnp.float32)
    o_ref[0] = acc + bfc_ref[...]


def prepare_params(params, input_dims):
    """One-time, host-side reshuffle of CN parameters into kernel layouts."""
    w1, b1, w2, b2, wfc, bfc = params
    H, W, C_in = int(input_dims[0]), int(input_dims[1]), int(input_dims[2])
    w1 = np.asarray(w1, np.float32); b1 = np.asarray(b1, np.float32)
    w2 = np.asarray(w2, np.float32); b2 = np.asarray(b2, np.float32)
    wfc = np.asarray(wfc, np.float32); bfc = np.asarray(bfc, np.float32)

    C1, _, KH, KW = w1.shape                 # conv1.weight: (16, C_in, 5, 5)
    C2 = int(w2.shape[0])                    # conv2.weight: (6, 16, 5, 5)
    O = int(wfc.shape[0])                    # fc1.weight:   (O, 6*H4*W4)
    assert H % 4 == 0 and W % 4 == 0 and KH == KW and KH % 2 == 1
    H2, W2, H4, W4 = H // 2, W // 2, H // 4, W // 4
    assert wfc.shape[1] == C2 * H4 * W4
    O_PAD = max(128, ((O + 127) // 128) * 128)     # lane-dense fc output columns

    def banded(w, w_out, in_stride):
        # w: (C_out, C_in, KH, KW) torch layout.
        # rows: input lane (in_stride*xin)*C_in + ci ; cols: output lane x*C_out + co.
        # 'same' x-padding is encoded by simply dropping out-of-range taps.
        co_n, ci_n, kh, kw = w.shape
        p = (kw - 1) // 2
        big = np.zeros((kh, in_stride * w_out * ci_n, w_out * co_n), np.float32)
        for dy in range(kh):
            for dx in range(kw):
                blk = w[:, :, dy, dx].T                      # (C_in, C_out)
                for x in range(w_out):
                    xin = x + dx - p
                    if 0 <= xin < w_out:
                        r = in_stride * xin * ci_n
                        big[dy, r:r + ci_n, x * co_n:(x + 1) * co_n] = blk
        return big

    L1P = W * C1 - C1                        # pooled layer-1 lane width
    L2P = W2 * C2 - C2
    w1big = banded(w1, W, 1)                              # (KH, W*C_in, W*C1)
    w2big = banded(w2, W2, 2)[:, :L1P, :]                 # (KH, L1P, W2*C2)

    # fc: rows index the uncompacted pooled-2 lanes 2*x4*C2 + c, torch NCHW flatten
    # order baked into which row each wfc column lands on; cols zero-padded to 128.
    wfcbig = np.zeros((H4, L2P, O_PAD), np.float32)
    for h4 in range(H4):
        for x4 in range(W4):
            for c in range(C2):
                wfcbig[h4, 2 * x4 * C2 + c, :O] = wfc[:, c * H4 * W4 + h4 * W4 + x4]
    bfcp = np.zeros((1, O_PAD), np.float32)
    bfcp[0, :O] = bfc

    b1t = np.tile(b1, W).reshape(1, W * C1)               # lane x*C1+c -> b1[c]
    b2t = np.tile(b2, W2).reshape(1, W2 * C2)

    meta = dict(H=H, W=W, C_in=C_in, C1=C1, C2=C2, KH=KH, O=O, O_PAD=O_PAD)
    return (jnp.asarray(w1big), jnp.asarray(b1t), jnp.asarray(w2big),
            jnp.asarray(b2t), jnp.asarray(wfcbig), jnp.asarray(bfcp), meta)


def cn_forward(x_nchw, prepared, *, batch_block=None):
    """Pallas CN.forward.  x_nchw: (N, C_in, H, W) -> (N, output_dim).

    batch_block: images per grid step (default: whole batch, capped at 32 to stay
    well inside scoped VMEM).  On v7x pass batch_block <= N//2 so the "parallel"
    grid axis spans both TensorCores; on v5e/v6e keep the largest block that fits.
    """
    w1big, b1t, w2big, b2t, wfcbig, bfcp, meta = prepared
    H, W, C_in = meta["H"], meta["W"], meta["C_in"]
    C1, C2, KH = meta["C1"], meta["C2"], meta["KH"]
    O, O_PAD = meta["O"], meta["O_PAD"]
    N = int(x_nchw.shape[0])
    assert x_nchw.shape == (N, C_in, H, W)
    H2, P = H // 2, (KH - 1) // 2
    L1P = W * C1 - C1
    OFF = 8                                   # sublane-aligned interior start

    if batch_block is None:
        NB = N if N <= 32 else max(d for d in range(1, 33) if N % d == 0)
    else:
        NB = int(batch_block)
    assert N % NB == 0
    G = N // NB

    # NHWC with (W, C) fused on the minor axis -> lane-dense (64-wide) input blocks.
    # TODO(synk): accept pre-fused (N, H, W*C_in) input to skip this HBM relayout.
    x_fused = jnp.transpose(x_nchw, (0, 2, 3, 1)).reshape(N, H, W * C_in)
    x_fused = x_fused.astype(jnp.float32)

    R1 = ((OFF + H + P + 7) // 8) * 8         # padded-slab rows, layer 1
    R2 = ((OFF + H2 + P + 7) // 8) * 8        # padded-slab rows, layer 2

    kernel = functools.partial(
        _cn_fused_kernel, NB=NB, H=H, W=W, C_in=C_in, C1=C1, C2=C2,
        KH=KH, OFF=OFF, O_PAD=O_PAD)

    out = pl.pallas_call(
        kernel,
        out_shape=jax.ShapeDtypeStruct((G, NB, O_PAD), jnp.float32),
        grid=(G,),
        in_specs=[
            pl.BlockSpec((NB, H, W * C_in), lambda g: (g, 0, 0)),     # x (fused W*C)
            pl.BlockSpec(w1big.shape, lambda g: (0, 0, 0)),           # conv1 banded
            pl.BlockSpec(b1t.shape, lambda g: (0, 0)),                # conv1 bias
            pl.BlockSpec(w2big.shape, lambda g: (0, 0, 0)),           # conv2 banded
            pl.BlockSpec(b2t.shape, lambda g: (0, 0)),                # conv2 bias
            pl.BlockSpec(wfcbig.shape, lambda g: (0, 0, 0)),          # fc (128-padded)
            pl.BlockSpec(bfcp.shape, lambda g: (0, 0)),               # fc bias
        ],
        out_specs=pl.BlockSpec((1, NB, O_PAD), lambda g: (g, 0, 0)),
        scratch_shapes=[
            pltpu.VMEM((NB, R1, W * C_in), jnp.float32),   # padded layer-1 slab
            pltpu.VMEM((NB, R2, L1P), jnp.float32),        # padded layer-2 slab
        ],
        compiler_params=pltpu.CompilerParams(
            dimension_semantics=("parallel",),
            vmem_limit_bytes=32 * 1024 * 1024),
    )(x_fused, w1big, b1t, w2big, b2t, wfcbig, bfcp)
    return out.reshape(N, O_PAD)[:, :O]


def cn_reference(x_nchw, params):
    """Pure-JAX reference mirroring the PyTorch forward."""
    w1, b1, w2, b2, wfc, bfc = params
    dn = ("NCHW", "OIHW", "NCHW")
    y = lax.conv_general_dilated(x_nchw, w1, (1, 1), ((2, 2), (2, 2)), dimension_numbers=dn)
    y = jnp.maximum(y + b1[None, :, None, None], 0.0)
    y = lax.reduce_window(y, -jnp.inf, lax.max, (1, 1, 2, 2), (1, 1, 2, 2), "VALID")
    y = lax.conv_general_dilated(y, w2, (1, 1), ((2, 2), (2, 2)), dimension_numbers=dn)
    y = jnp.maximum(y + b2[None, :, None, None], 0.0)
    y = lax.reduce_window(y, -jnp.inf, lax.max, (1, 1, 2, 2), (1, 1, 2, 2), "VALID")
    y = y.reshape(y.shape[0], -1)
    return y @ wfc.T + bfc


if __name__ == "__main__":
    # input_dims = (H, W, C_in) per the module's indexing convention.
    input_dims = (16, 16, 4)
    output_dim = 32
    N = 2
    H, W, C_in = input_dims
    F = 6 * (H // 4) * (W // 4)

    k = jax.random.split(jax.random.PRNGKey(0), 7)
    x = jax.random.normal(k[0], (N, C_in, H, W), jnp.float32)
    w1 = 0.1 * jax.random.normal(k[1], (16, C_in, 5, 5), jnp.float32)    # conv1.weight
    b1 = 0.1 * jax.random.normal(k[2], (16,), jnp.float32)               # conv1.bias
    w2 = 0.1 * jax.random.normal(k[3], (6, 16, 5, 5), jnp.float32)       # conv2.weight
    b2 = 0.1 * jax.random.normal(k[4], (6,), jnp.float32)                # conv2.bias
    wfc = 0.1 * jax.random.normal(k[5], (output_dim, F), jnp.float32)    # fc1.weight
    bfc = 0.1 * jax.random.normal(k[6], (output_dim,), jnp.float32)      # fc1.bias
    params = (w1, b1, w2, b2, wfc, bfc)

    prepared = prepare_params(params, input_dims)   # one-time weight reshuffle
    out = jax.block_until_ready(cn_forward(x, prepared))
    ref = cn_reference(x, params)

    assert out.shape == (N, output_dim), out.shape
    err = float(jnp.max(jnp.abs(out - ref)))
    if not jnp.allclose(out, ref, atol=2e-3, rtol=2e-3):
        raise AssertionError(f"mismatch: max abs err {err}")
    print("KERNEL_OK")
</pallas_src>

<mosaic_0001>
module attributes {stable_mosaic.version = 11 : i64} {
  func.func @_cn_fused_kernel(%arg0: i32, %arg1: memref<2x16x64xf32, #tpu.memory_space<vmem>>, %arg2: memref<5x64x256xf32, #tpu.memory_space<vmem>>, %arg3: memref<1x256xf32, #tpu.memory_space<vmem>>, %arg4: memref<5x240x48xf32, #tpu.memory_space<vmem>>, %arg5: memref<1x48xf32, #tpu.memory_space<vmem>>, %arg6: memref<4x42x128xf32, #tpu.memory_space<vmem>>, %arg7: memref<1x128xf32, #tpu.memory_space<vmem>>, %arg8: memref<1x2x128xf32, #tpu.memory_space<vmem>>, %arg9: memref<2x32x64xf32, #tpu.memory_space<vmem>>, %arg10: memref<2x24x240xf32, #tpu.memory_space<vmem>>) attributes {dimension_semantics = [#tpu.dimension_semantics<parallel>], iteration_bounds = array<i64: 1>, scalar_prefetch = 0 : i64, scratch_operands = 2 : i64, tpu.core_type = #tpu.core_type<tc>, window_params = [{transform_indices = @transform_0, window_bounds = array<i64: 2, 16, 64>}, {pipeline_mode = #tpu.pipeline_mode<synchronous>, transform_indices = @transform_1, window_bounds = array<i64: 5, 64, 256>}, {pipeline_mode = #tpu.pipeline_mode<synchronous>, transform_indices = @transform_2, window_bounds = array<i64: 1, 256>}, {pipeline_mode = #tpu.pipeline_mode<synchronous>, transform_indices = @transform_3, window_bounds = array<i64: 5, 240, 48>}, {pipeline_mode = #tpu.pipeline_mode<synchronous>, transform_indices = @transform_4, window_bounds = array<i64: 1, 48>}, {pipeline_mode = #tpu.pipeline_mode<synchronous>, transform_indices = @transform_5, window_bounds = array<i64: 4, 42, 128>}, {pipeline_mode = #tpu.pipeline_mode<synchronous>, transform_indices = @transform_6, window_bounds = array<i64: 1, 128>}, {transform_indices = @transform_7, window_bounds = array<i64: 1, 2, 128>}]} {
    %cst = arith.constant 0.000000e+00 : f32
    %0 = vector.broadcast %cst : f32 to vector<2x2x64xf32>
    %c0 = arith.constant 0 : index
    %c6 = arith.constant 6 : index
    %c0_0 = arith.constant 0 : index
    %1 = vector.load %arg9[%c0, %c6, %c0_0] : memref<2x32x64xf32, #tpu.memory_space<vmem>>, vector<2x2x64xf32>
    tpu.vector_store %arg9[%c0, %c6, %c0_0], %0 {strides = array<i32>} : memref<2x32x64xf32, #tpu.memory_space<vmem>>, vector<2x2x64xf32>,
    %cst_1 = arith.constant 0.000000e+00 : f32
    %2 = vector.broadcast %cst_1 : f32 to vector<2x2x64xf32>
    %c0_2 = arith.constant 0 : index
    %c24 = arith.constant 24 : index
    %c0_3 = arith.constant 0 : index
    %3 = vector.load %arg9[%c0_2, %c24, %c0_3] : memref<2x32x64xf32, #tpu.memory_space<vmem>>, vector<2x2x64xf32>
    tpu.vector_store %arg9[%c0_2, %c24, %c0_3], %2 {strides = array<i32>} : memref<2x32x64xf32, #tpu.memory_space<vmem>>, vector<2x2x64xf32>,
    %cst_4 = arith.constant 0.000000e+00 : f32
    %4 = vector.broadcast %cst_4 : f32 to vector<2x2x240xf32>
    %c0_5 = arith.constant 0 : index
    %c6_6 = arith.constant 6 : index
    %c0_7 = arith.constant 0 : index
    %5 = vector.load %arg10[%c0_5, %c6_6, %c0_7] : memref<2x24x240xf32, #tpu.memory_space<vmem>>, vector<2x2x240xf32>
    tpu.vector_store %arg10[%c0_5, %c6_6, %c0_7], %4 {strides = array<i32>} : memref<2x24x240xf32, #tpu.memory_space<vmem>>, vector<2x2x240xf32>,
    %cst_8 = arith.constant 0.000000e+00 : f32
    %6 = vector.broadcast %cst_8 : f32 to vector<2x2x240xf32>
    %c0_9 = arith.constant 0 : index
    %c16 = arith.constant 16 : index
    %c0_10 = arith.constant 0 : index
    %7 = vector.load %arg10[%c0_9, %c16, %c0_10] : memref<2x24x240xf32, #tpu.memory_space<vmem>>, vector<2x2x240xf32>
    tpu.vector_store %arg10[%c0_9, %c16, %c0_10], %6 {strides = array<i32>} : memref<2x24x240xf32, #tpu.memory_space<vmem>>, vector<2x2x240xf32>,
    %c0_11 = arith.constant 0 : index
    %c0_12 = arith.constant 0 : index
    %c0_13 = arith.constant 0 : index
    %8 = vector.load %arg1[%c0_11, %c0_12, %c0_13] : memref<2x16x64xf32, #tpu.memory_space<vmem>>, vector<2x16x64xf32>
    %c0_14 = arith.constant 0 : index
    %c8 = arith.constant 8 : index
    %c0_15 = arith.constant 0 : index
    %9 = vector.load %arg9[%c0_14, %c8, %c0_15] : memref<2x32x64xf32, #tpu.memory_space<vmem>>, vector<2x16x64xf32>
    tpu.vector_store %arg9[%c0_14, %c8, %c0_15], %8 {strides = array<i32>} : memref<2x32x64xf32, #tpu.memory_space<vmem>>, vector<2x16x64xf32>,
    %cst_16 = arith.constant 0.000000e+00 : f32
    %10 = vector.broadcast %cst_16 : f32 to vector<32x256xf32>
    %c0_17 = arith.constant 0 : index
    %c6_18 = arith.constant 6 : index
    %c0_19 = arith.constant 0 : index
    %11 = vector.load %arg9[%c0_17, %c6_18, %c0_19] : memref<2x32x64xf32, #tpu.memory_space<vmem>>, vector<2x16x64xf32>
    %12 = vector.shape_cast %11 : vector<2x16x64xf32> to vector<32x64xf32>
    %c0_20 = arith.constant 0 : index
    %c0_21 = arith.constant 0 : index
    %c0_22 = arith.constant 0 : index
    %13 = vector.load %arg2[%c0_20, %c0_21, %c0_22] : memref<5x64x256xf32, #tpu.memory_space<vmem>>, vector<1x64x256xf32>
    %14 = vector.shape_cast %13 : vector<1x64x256xf32> to vector<64x256xf32>
    %cst_23 = arith.constant dense<0.000000e+00> : vector<32x256xf32>
    %15 = tpu.matmul %12, %14, %cst_23 {dimension_numbers = #tpu.dot_dimension_numbers<[1], [0], [0], [1], [0, 0, 1, 1], [], []>} : vector<32x64xf32>, vector<64x256xf32>, vector<32x256xf32> -> vector<32x256xf32>
    %16 = arith.addf %10, %15 : vector<32x256xf32>
    %c0_24 = arith.constant 0 : index
    %c7 = arith.constant 7 : index
    %c0_25 = arith.constant 0 : index
    %17 = vector.load %arg9[%c0_24, %c7, %c0_25] : memref<2x32x64xf32, #tpu.memory_space<vmem>>, vector<2x16x64xf32>
    %18 = vector.shape_cast %17 : vector<2x16x64xf32> to vector<32x64xf32>
    %c1 = arith.constant 1 : index
    %c0_26 = arith.constant 0 : index
    %c0_27 = arith.constant 0 : index
    %19 = vector.load %arg2[%c1, %c0_26, %c0_27] : memref<5x64x256xf32, #tpu.memory_space<vmem>>, vector<1x64x256xf32>
    %20 = vector.shape_cast %19 : vector<1x64x256xf32> to vector<64x256xf32>
    %cst_28 = arith.constant dense<0.000000e+00> : vector<32x256xf32>
    %21 = tpu.matmul %18, %20, %cst_28 {dimension_numbers = #tpu.dot_dimension_numbers<[1], [0], [0], [1], [0, 0, 1, 1], [], []>} : vector<32x64xf32>, vector<64x256xf32>, vector<32x256xf32> -> vector<32x256xf32>
    %22 = arith.addf %16, %21 : vector<32x256xf32>
    %c0_29 = arith.constant 0 : index
    %c8_30 = arith.constant 8 : index
    %c0_31 = arith.constant 0 : index
    %23 = vector.load %arg9[%c0_29, %c8_30, %c0_31] : memref<2x32x64xf32, #tpu.memory_space<vmem>>, vector<2x16x64xf32>
    %24 = vector.shape_cast %23 : vector<2x16x64xf32> to vector<32x64xf32>
    %c2 = arith.constant 2 : index
    %c0_32 = arith.constant 0 : index
    %c0_33 = arith.constant 0 : index
    %25 = vector.load %arg2[%c2, %c0_32, %c0_33] : memref<5x64x256xf32, #tpu.memory_space<vmem>>, vector<1x64x256xf32>
    %26 = vector.shape_cast %25 : vector<1x64x256xf32> to vector<64x256xf32>
    %cst_34 = arith.constant dense<0.000000e+00> : vector<32x256xf32>
    %27 = tpu.matmul %24, %26, %cst_34 {dimension_numbers = #tpu.dot_dimension_numbers<[1], [0], [0], [1], [0, 0, 1, 1], [], []>} : vector<32x64xf32>, vector<64x256xf32>, vector<32x256xf32> -> vector<32x256xf32>
    %28 = arith.addf %22, %27 : vector<32x256xf32>
    %c0_35 = arith.constant 0 : index
    %c9 = arith.constant 9 : index
    %c0_36 = arith.constant 0 : index
    %29 = vector.load %arg9[%c0_35, %c9, %c0_36] : memref<2x32x64xf32, #tpu.memory_space<vmem>>, vector<2x16x64xf32>
    %30 = vector.shape_cast %29 : vector<2x16x64xf32> to vector<32x64xf32>
    %c3 = arith.constant 3 : index
    %c0_37 = arith.constant 0 : index
    %c0_38 = arith.constant 0 : index
    %31 = vector.load %arg2[%c3, %c0_37, %c0_38] : memref<5x64x256xf32, #tpu.memory_space<vmem>>, vector<1x64x256xf32>
    %32 = vector.shape_cast %31 : vector<1x64x256xf32> to vector<64x256xf32>
    %cst_39 = arith.constant dense<0.000000e+00> : vector<32x256xf32>
    %33 = tpu.matmul %30, %32, %cst_39 {dimension_numbers = #tpu.dot_dimension_numbers<[1], [0], [0], [1], [0, 0, 1, 1], [], []>} : vector<32x64xf32>, vector<64x256xf32>, vector<32x256xf32> -> vector<32x256xf32>
    %34 = arith.addf %28, %33 : vector<32x256xf32>
    %c0_40 = arith.constant 0 : index
    %c10 = arith.constant 10 : index
    %c0_41 = arith.constant 0 : index
    %35 = vector.load %arg9[%c0_40, %c10, %c0_41] : memref<2x32x64xf32, #tpu.memory_space<vmem>>, vector<2x16x64xf32>
    %36 = vector.shape_cast %35 : vector<2x16x64xf32> to vector<32x64xf32>
    %c4 = arith.constant 4 : index
    %c0_42 = arith.constant 0 : index
    %c0_43 = arith.constant 0 : index
    %37 = vector.load %arg2[%c4, %c0_42, %c0_43] : memref<5x64x256xf32, #tpu.memory_space<vmem>>, vector<1x64x256xf32>
    %38 = vector.shape_cast %37 : vector<1x64x256xf32> to vector<64x256xf32>
    %cst_44 = arith.constant dense<0.000000e+00> : vector<32x256xf32>
    %39 = tpu.matmul %36, %38, %cst_44 {dimension_numbers = #tpu.dot_dimension_numbers<[1], [0], [0], [1], [0, 0, 1, 1], [], []>} : vector<32x64xf32>, vector<64x256xf32>, vector<32x256xf32> -> vector<32x256xf32>
    %40 = arith.addf %34, %39 : vector<32x256xf32>
    %c0_45 = arith.constant 0 : index
    %c0_46 = arith.constant 0 : index
    %41 = vector.load %arg3[%c0_45, %c0_46] : memref<1x256xf32, #tpu.memory_space<vmem>>, vector<1x256xf32>
    %42 = vector.broadcast %41 : vector<1x256xf32> to vector<32x256xf32>
    %43 = arith.addf %40, %42 : vector<32x256xf32>
    %cst_47 = arith.constant 0.000000e+00 : f32
    %44 = vector.broadcast %cst_47 : f32 to vector<32x256xf32>
    %45 = arith.maximumf %43, %44 : vector<32x256xf32>
    %46 = vector.extract_strided_slice %45 {offsets = [0, 0], sizes = [32, 240], strides = [1, 1]} : vector<32x256xf32> to vector<32x240xf32>
    %47 = vector.extract_strided_slice %45 {offsets = [0, 16], sizes = [32, 240], strides = [1, 1]} : vector<32x256xf32> to vector<32x240xf32>
    %48 = arith.maximumf %46, %47 : vector<32x240xf32>
    %49 = vector.shape_cast %48 : vector<32x240xf32> to vector<2x16x240xf32>
    %50 = vector.extract_strided_slice %49 {offsets = [0, 0, 0], sizes = [2, 1, 240], strides = [1, 1, 1]} : vector<2x16x240xf32> to vector<2x1x240xf32>
    %51 = vector.shape_cast %50 : vector<2x1x240xf32> to vector<2x240xf32>
    %52 = vector.extract_strided_slice %49 {offsets = [0, 1, 0], sizes = [2, 1, 240], strides = [1, 1, 1]} : vector<2x16x240xf32> to vector<2x1x240xf32>
    %53 = vector.shape_cast %52 : vector<2x1x240xf32> to vector<2x240xf32>
    %54 = arith.maximumf %51, %53 : vector<2x240xf32>
    %c0_48 = arith.constant 0 : index
    %c8_49 = arith.constant 8 : index
    %c0_50 = arith.constant 0 : index
    %55 = vector.load %arg10[%c0_48, %c8_49, %c0_50] : memref<2x24x240xf32, #tpu.memory_space<vmem>>, vector<2x1x240xf32>
    %56 = vector.shape_cast %55 : vector<2x1x240xf32> to vector<2x240xf32>
    %57 = vector.shape_cast %54 : vector<2x240xf32> to vector<2x1x240xf32>
    tpu.vector_store %arg10[%c0_48, %c8_49, %c0_50], %57 {strides = array<i32>} : memref<2x24x240xf32, #tpu.memory_space<vmem>>, vector<2x1x240xf32>,
    %58 = vector.extract_strided_slice %49 {offsets = [0, 2, 0], sizes = [2, 1, 240], strides = [1, 1, 1]} : vector<2x16x240xf32> to vector<2x1x240xf32>
    %59 = vector.shape_cast %58 : vector<2x1x240xf32> to vector<2x240xf32>
    %60 = vector.extract_strided_slice %49 {offsets = [0, 3, 0], sizes = [2, 1, 240], strides = [1, 1, 1]} : vector<2x16x240xf32> to vector<2x1x240xf32>
    %61 = vector.shape_cast %60 : vector<2x1x240xf32> to vector<2x240xf32>
    %62 = arith.maximumf %59, %61 : vector<2x240xf32>
    %c0_51 = arith.constant 0 : index
    %c9_52 = arith.constant 9 : index
    %c0_53 = arith.constant 0 : index
    %63 = vector.load %arg10[%c0_51, %c9_52, %c0_53] : memref<2x24x240xf32, #tpu.memory_space<vmem>>, vector<2x1x240xf32>
    %64 = vector.shape_cast %63 : vector<2x1x240xf32> to vector<2x240xf32>
    %65 = vector.shape_cast %62 : vector<2x240xf32> to vector<2x1x240xf32>
    tpu.vector_store %arg10[%c0_51, %c9_52, %c0_53], %65 {strides = array<i32>} : memref<2x24x240xf32, #tpu.memory_space<vmem>>, vector<2x1x240xf32>,
    %66 = vector.extract_strided_slice %49 {offsets = [0, 4, 0], sizes = [2, 1, 240], strides = [1, 1, 1]} : vector<2x16x240xf32> to vector<2x1x240xf32>
    %67 = vector.shape_cast %66 : vector<2x1x240xf32> to vector<2x240xf32>
    %68 = vector.extract_strided_slice %49 {offsets = [0, 5, 0], sizes = [2, 1, 240], strides = [1, 1, 1]} : vector<2x16x240xf32> to vector<2x1x240xf32>
    %69 = vector.shape_cast %68 : vector<2x1x240xf32> to vector<2x240xf32>
    %70 = arith.maximumf %67, %69 : vector<2x240xf32>
    %c0_54 = arith.constant 0 : index
    %c10_55 = arith.constant 10 : index
    %c0_56 = arith.constant 0 : index
    %71 = vector.load %arg10[%c0_54, %c10_55, %c0_56] : memref<2x24x240xf32, #tpu.memory_space<vmem>>, vector<2x1x240xf32>
    %72 = vector.shape_cast %71 : vector<2x1x240xf32> to vector<2x240xf32>
    %73 = vector.shape_cast %70 : vector<2x240xf32> to vector<2x1x240xf32>
    tpu.vector_store %arg10[%c0_54, %c10_55, %c0_56], %73 {strides = array<i32>} : memref<2x24x240xf32, #tpu.memory_space<vmem>>, vector<2x1x240xf32>,
    %74 = vector.extract_strided_slice %49 {offsets = [0, 6, 0], sizes = [2, 1, 240], strides = [1, 1, 1]} : vector<2x16x240xf32> to vector<2x1x240xf32>
    %75 = vector.shape_cast %74 : vector<2x1x240xf32> to vector<2x240xf32>
    %76 = vector.extract_strided_slice %49 {offsets = [0, 7, 0], sizes = [2, 1, 240], strides = [1, 1, 1]} : vector<2x16x240xf32> to vector<2x1x240xf32>
    %77 = vector.shape_cast %76 : vector<2x1x240xf32> to vector<2x240xf32>
    %78 = arith.maximumf %75, %77 : vector<2x240xf32>
    %c0_57 = arith.constant 0 : index
    %c11 = arith.constant 11 : index
    %c0_58 = arith.constant 0 : index
    %79 = vector.load %arg10[%c0_57, %c11, %c0_58] : memref<2x24x240xf32, #tpu.memory_space<vmem>>, vector<2x1x240xf32>
    %80 = vector.shape_cast %79 : vector<2x1x240xf32> to vector<2x240xf32>
    %81 = vector.shape_cast %78 : vector<2x240xf32> to vector<2x1x240xf32>
    tpu.vector_store %arg10[%c0_57, %c11, %c0_58], %81 {strides = array<i32>} : memref<2x24x240xf32, #tpu.memory_space<vmem>>, vector<2x1x240xf32>,
    %82 = vector.extract_strided_slice %49 {offsets = [0, 8, 0], sizes = [2, 1, 240], strides = [1, 1, 1]} : vector<2x16x240xf32> to vector<2x1x240xf32>
    %83 = vector.shape_cast %82 : vector<2x1x240xf32> to vector<2x240xf32>
    %84 = vector.extract_strided_slice %49 {offsets = [0, 9, 0], sizes = [2, 1, 240], strides = [1, 1, 1]} : vector<2x16x240xf32> to vector<2x1x240xf32>
    %85 = vector.shape_cast %84 : vector<2x1x240xf32> to vector<2x240xf32>
    %86 = arith.maximumf %83, %85 : vector<2x240xf32>
    %c0_59 = arith.constant 0 : index
    %c12 = arith.constant 12 : index
    %c0_60 = arith.constant 0 : index
    %87 = vector.load %arg10[%c0_59, %c12, %c0_60] : memref<2x24x240xf32, #tpu.memory_space<vmem>>, vector<2x1x240xf32>
    %88 = vector.shape_cast %87 : vector<2x1x240xf32> to vector<2x240xf32>
    %89 = vector.shape_cast %86 : vector<2x240xf32> to vector<2x1x240xf32>
    tpu.vector_store %arg10[%c0_59, %c12, %c0_60], %89 {strides = array<i32>} : memref<2x24x240xf32, #tpu.memory_space<vmem>>, vector<2x1x240xf32>,
    %90 = vector.extract_strided_slice %49 {offsets = [0, 10, 0], sizes = [2, 1, 240], strides = [1, 1, 1]} : vector<2x16x240xf32> to vector<2x1x240xf32>
    %91 = vector.shape_cast %90 : vector<2x1x240xf32> to vector<2x240xf32>
    %92 = vector.extract_strided_slice %49 {offsets = [0, 11, 0], sizes = [2, 1, 240], strides = [1, 1, 1]} : vector<2x16x240xf32> to vector<2x1x240xf32>
    %93 = vector.shape_cast %92 : vector<2x1x240xf32> to vector<2x240xf32>
    %94 = arith.maximumf %91, %93 : vector<2x240xf32>
    %c0_61 = arith.constant 0 : index
    %c13 = arith.constant 13 : index
    %c0_62 = arith.constant 0 : index
    %95 = vector.load %arg10[%c0_61, %c13, %c0_62] : memref<2x24x240xf32, #tpu.memory_space<vmem>>, vector<2x1x240xf32>
    %96 = vector.shape_cast %95 : vector<2x1x240xf32> to vector<2x240xf32>
    %97 = vector.shape_cast %94 : vector<2x240xf32> to vector<2x1x240xf32>
    tpu.vector_store %arg10[%c0_61, %c13, %c0_62], %97 {strides = array<i32>} : memref<2x24x240xf32, #tpu.memory_space<vmem>>, vector<2x1x240xf32>,
    %98 = vector.extract_strided_slice %49 {offsets = [0, 12, 0], sizes = [2, 1, 240], strides = [1, 1, 1]} : vector<2x16x240xf32> to vector<2x1x240xf32>
    %99 = vector.shape_cast %98 : vector<2x1x240xf32> to vector<2x240xf32>
    %100 = vector.extract_strided_slice %49 {offsets = [0, 13, 0], sizes = [2, 1, 240], strides = [1, 1, 1]} : vector<2x16x240xf32> to vector<2x1x240xf32>
    %101 = vector.shape_cast %100 : vector<2x1x240xf32> to vector<2x240xf32>
    %102 = arith.maximumf %99, %101 : vector<2x240xf32>
    %c0_63 = arith.constant 0 : index
    %c14 = arith.constant 14 : index
    %c0_64 = arith.constant 0 : index
    %103 = vector.load %arg10[%c0_63, %c14, %c0_64] : memref<2x24x240xf32, #tpu.memory_space<vmem>>, vector<2x1x240xf32>
    %104 = vector.shape_cast %103 : vector<2x1x240xf32> to vector<2x240xf32>
    %105 = vector.shape_cast %102 : vector<2x240xf32> to vector<2x1x240xf32>
    tpu.vector_store %arg10[%c0_63, %c14, %c0_64], %105 {strides = array<i32>} : memref<2x24x240xf32, #tpu.memory_space<vmem>>, vector<2x1x240xf32>,
    %106 = vector.extract_strided_slice %49 {offsets = [0, 14, 0], sizes = [2, 1, 240], strides = [1, 1, 1]} : vector<2x16x240xf32> to vector<2x1x240xf32>
    %107 = vector.shape_cast %106 : vector<2x1x240xf32> to vector<2x240xf32>
    %108 = vector.extract_strided_slice %49 {offsets = [0, 15, 0], sizes = [2, 1, 240], strides = [1, 1, 1]} : vector<2x16x240xf32> to vector<2x1x240xf32>
    %109 = vector.shape_cast %108 : vector<2x1x240xf32> to vector<2x240xf32>
    %110 = arith.maximumf %107, %109 : vector<2x240xf32>
    %c0_65 = arith.constant 0 : index
    %c15 = arith.constant 15 : index
    %c0_66 = arith.constant 0 : index
    %111 = vector.load %arg10[%c0_65, %c15, %c0_66] : memref<2x24x240xf32, #tpu.memory_space<vmem>>, vector<2x1x240xf32>
    %112 = vector.shape_cast %111 : vector<2x1x240xf32> to vector<2x240xf32>
    %113 = vector.shape_cast %110 : vector<2x240xf32> to vector<2x1x240xf32>
    tpu.vector_store %arg10[%c0_65, %c15, %c0_66], %113 {strides = array<i32>} : memref<2x24x240xf32, #tpu.memory_space<vmem>>, vector<2x1x240xf32>,
    %cst_67 = arith.constant 0.000000e+00 : f32
    %114 = vector.broadcast %cst_67 : f32 to vector<16x48xf32>
    %c0_68 = arith.constant 0 : index
    %c6_69 = arith.constant 6 : index
    %c0_70 = arith.constant 0 : index
    %115 = vector.load %arg10[%c0_68, %c6_69, %c0_70] : memref<2x24x240xf32, #tpu.memory_space<vmem>>, vector<2x8x240xf32>
    %116 = vector.shape_cast %115 : vector<2x8x240xf32> to vector<16x240xf32>
    %c0_71 = arith.constant 0 : index
    %c0_72 = arith.constant 0 : index
    %c0_73 = arith.constant 0 : index
    %117 = vector.load %arg4[%c0_71, %c0_72, %c0_73] : memref<5x240x48xf32, #tpu.memory_space<vmem>>, vector<1x240x48xf32>
    %118 = vector.shape_cast %117 : vector<1x240x48xf32> to vector<240x48xf32>
    %cst_74 = arith.constant dense<0.000000e+00> : vector<16x48xf32>
    %119 = tpu.matmul %116, %118, %cst_74 {dimension_numbers = #tpu.dot_dimension_numbers<[1], [0], [0], [1], [0, 0, 1, 1], [], []>} : vector<16x240xf32>, vector<240x48xf32>, vector<16x48xf32> -> vector<16x48xf32>
    %120 = arith.addf %114, %119 : vector<16x48xf32>
    %c0_75 = arith.constant 0 : index
    %c7_76 = arith.constant 7 : index
    %c0_77 = arith.constant 0 : index
    %121 = vector.load %arg10[%c0_75, %c7_76, %c0_77] : memref<2x24x240xf32, #tpu.memory_space<vmem>>, vector<2x8x240xf32>
    %122 = vector.shape_cast %121 : vector<2x8x240xf32> to vector<16x240xf32>
    %c1_78 = arith.constant 1 : index
    %c0_79 = arith.constant 0 : index
    %c0_80 = arith.constant 0 : index
    %123 = vector.load %arg4[%c1_78, %c0_79, %c0_80] : memref<5x240x48xf32, #tpu.memory_space<vmem>>, vector<1x240x48xf32>
    %124 = vector.shape_cast %123 : vector<1x240x48xf32> to vector<240x48xf32>
    %cst_81 = arith.constant dense<0.000000e+00> : vector<16x48xf32>
    %125 = tpu.matmul %122, %124, %cst_81 {dimension_numbers = #tpu.dot_dimension_numbers<[1], [0], [0], [1], [0, 0, 1, 1], [], []>} : vector<16x240xf32>, vector<240x48xf32>, vector<16x48xf32> -> vector<16x48xf32>
    %126 = arith.addf %120, %125 : vector<16x48xf32>
    %c0_82 = arith.constant 0 : index
    %c8_83 = arith.constant 8 : index
    %c0_84 = arith.constant 0 : index
    %127 = vector.load %arg10[%c0_82, %c8_83, %c0_84] : memref<2x24x240xf32, #tpu.memory_space<vmem>>, vector<2x8x240xf32>
    %128 = vector.shape_cast %127 : vector<2x8x240xf32> to vector<16x240xf32>
    %c2_85 = arith.constant 2 : index
    %c0_86 = arith.constant 0 : index
    %c0_87 = arith.constant 0 : index
    %129 = vector.load %arg4[%c2_85, %c0_86, %c0_87] : memref<5x240x48xf32, #tpu.memory_space<vmem>>, vector<1x240x48xf32>
    %130 = vector.shape_cast %129 : vector<1x240x48xf32> to vector<240x48xf32>
    %cst_88 = arith.constant dense<0.000000e+00> : vector<16x48xf32>
    %131 = tpu.matmul %128, %130, %cst_88 {dimension_numbers = #tpu.dot_dimension_numbers<[1], [0], [0], [1], [0, 0, 1, 1], [], []>} : vector<16x240xf32>, vector<240x48xf32>, vector<16x48xf32> -> vector<16x48xf32>
    %132 = arith.addf %126, %131 : vector<16x48xf32>
    %c0_89 = arith.constant 0 : index
    %c9_90 = arith.constant 9 : index
    %c0_91 = arith.constant 0 : index
    %133 = vector.load %arg10[%c0_89, %c9_90, %c0_91] : memref<2x24x240xf32, #tpu.memory_space<vmem>>, vector<2x8x240xf32>
    %134 = vector.shape_cast %133 : vector<2x8x240xf32> to vector<16x240xf32>
    %c3_92 = arith.constant 3 : index
    %c0_93 = arith.constant 0 : index
    %c0_94 = arith.constant 0 : index
    %135 = vector.load %arg4[%c3_92, %c0_93, %c0_94] : memref<5x240x48xf32, #tpu.memory_space<vmem>>, vector<1x240x48xf32>
    %136 = vector.shape_cast %135 : vector<1x240x48xf32> to vector<240x48xf32>
    %cst_95 = arith.constant dense<0.000000e+00> : vector<16x48xf32>
    %137 = tpu.matmul %134, %136, %cst_95 {dimension_numbers = #tpu.dot_dimension_numbers<[1], [0], [0], [1], [0, 0, 1, 1], [], []>} : vector<16x240xf32>, vector<240x48xf32>, vector<16x48xf32> -> vector<16x48xf32>
    %138 = arith.addf %132, %137 : vector<16x48xf32>
    %c0_96 = arith.constant 0 : index
    %c10_97 = arith.constant 10 : index
    %c0_98 = arith.constant 0 : index
    %139 = vector.load %arg10[%c0_96, %c10_97, %c0_98] : memref<2x24x240xf32, #tpu.memory_space<vmem>>, vector<2x8x240xf32>
    %140 = vector.shape_cast %139 : vector<2x8x240xf32> to vector<16x240xf32>
    %c4_99 = arith.constant 4 : index
    %c0_100 = arith.constant 0 : index
    %c0_101 = arith.constant 0 : index
    %141 = vector.load %arg4[%c4_99, %c0_100, %c0_101] : memref<5x240x48xf32, #tpu.memory_space<vmem>>, vector<1x240x48xf32>
    %142 = vector.shape_cast %141 : vector<1x240x48xf32> to vector<240x48xf32>
    %cst_102 = arith.constant dense<0.000000e+00> : vector<16x48xf32>
    %143 = tpu.matmul %140, %142, %cst_102 {dimension_numbers = #tpu.dot_dimension_numbers<[1], [0], [0], [1], [0, 0, 1, 1], [], []>} : vector<16x240xf32>, vector<240x48xf32>, vector<16x48xf32> -> vector<16x48xf32>
    %144 = arith.addf %138, %143 : vector<16x48xf32>
    %c0_103 = arith.constant 0 : index
    %c0_104 = arith.constant 0 : index
    %145 = vector.load %arg5[%c0_103, %c0_104] : memref<1x48xf32, #tpu.memory_space<vmem>>, vector<1x48xf32>
    %146 = vector.broadcast %145 : vector<1x48xf32> to vector<16x48xf32>
    %147 = arith.addf %144, %146 : vector<16x48xf32>
    %cst_105 = arith.constant 0.000000e+00 : f32
    %148 = vector.broadcast %cst_105 : f32 to vector<16x48xf32>
    %149 = arith.maximumf %147, %148 : vector<16x48xf32>
    %150 = vector.extract_strided_slice %149 {offsets = [0, 0], sizes = [16, 42], strides = [1, 1]} : vector<16x48xf32> to vector<16x42xf32>
    %151 = vector.extract_strided_slice %149 {offsets = [0, 6], sizes = [16, 42], strides = [1, 1]} : vector<16x48xf32> to vector<16x42xf32>
    %152 = arith.maximumf %150, %151 : vector<16x42xf32>
    %153 = vector.shape_cast %152 : vector<16x42xf32> to vector<2x8x42xf32>
    %cst_106 = arith.constant 0.000000e+00 : f32
    %154 = vector.broadcast %cst_106 : f32 to vector<2x128xf32>
    %155 = vector.extract_strided_slice %153 {offsets = [0, 0, 0], sizes = [2, 1, 42], strides = [1, 1, 1]} : vector<2x8x42xf32> to vector<2x1x42xf32>
    %156 = vector.shape_cast %155 : vector<2x1x42xf32> to vector<2x42xf32>
    %157 = vector.extract_strided_slice %153 {offsets = [0, 1, 0], sizes = [2, 1, 42], strides = [1, 1, 1]} : vector<2x8x42xf32> to vector<2x1x42xf32>
    %158 = vector.shape_cast %157 : vector<2x1x42xf32> to vector<2x42xf32>
    %159 = arith.maximumf %156, %158 : vector<2x42xf32>
    %c0_107 = arith.constant 0 : index
    %c0_108 = arith.constant 0 : index
    %c0_109 = arith.constant 0 : index
    %160 = vector.load %arg6[%c0_107, %c0_108, %c0_109] : memref<4x42x128xf32, #tpu.memory_space<vmem>>, vector<1x42x128xf32>
    %161 = vector.shape_cast %160 : vector<1x42x128xf32> to vector<42x128xf32>
    %cst_110 = arith.constant dense<0.000000e+00> : vector<2x128xf32>
    %162 = tpu.matmul %159, %161, %cst_110 {dimension_numbers = #tpu.dot_dimension_numbers<[1], [0], [0], [1], [0, 0, 1, 1], [], []>} : vector<2x42xf32>, vector<42x128xf32>, vector<2x128xf32> -> vector<2x128xf32>
    %163 = arith.addf %154, %162 : vector<2x128xf32>
    %164 = vector.extract_strided_slice %153 {offsets = [0, 2, 0], sizes = [2, 1, 42], strides = [1, 1, 1]} : vector<2x8x42xf32> to vector<2x1x42xf32>
    %165 = vector.shape_cast %164 : vector<2x1x42xf32> to vector<2x42xf32>
    %166 = vector.extract_strided_slice %153 {offsets = [0, 3, 0], sizes = [2, 1, 42], strides = [1, 1, 1]} : vector<2x8x42xf32> to vector<2x1x42xf32>
    %167 = vector.shape_cast %166 : vector<2x1x42xf32> to vector<2x42xf32>
    %168 = arith.maximumf %165, %167 : vector<2x42xf32>
    %c1_111 = arith.constant 1 : index
    %c0_112 = arith.constant 0 : index
    %c0_113 = arith.constant 0 : index
    %169 = vector.load %arg6[%c1_111, %c0_112, %c0_113] : memref<4x42x128xf32, #tpu.memory_space<vmem>>, vector<1x42x128xf32>
    %170 = vector.shape_cast %169 : vector<1x42x128xf32> to vector<42x128xf32>
    %cst_114 = arith.constant dense<0.000000e+00> : vector<2x128xf32>
    %171 = tpu.matmul %168, %170, %cst_114 {dimension_numbers = #tpu.dot_dimension_numbers<[1], [0], [0], [1], [0, 0, 1, 1], [], []>} : vector<2x42xf32>, vector<42x128xf32>, vector<2x128xf32> -> vector<2x128xf32>
    %172 = arith.addf %163, %171 : vector<2x128xf32>
    %173 = vector.extract_strided_slice %153 {offsets = [0, 4, 0], sizes = [2, 1, 42], strides = [1, 1, 1]} : vector<2x8x42xf32> to vector<2x1x42xf32>
    %174 = vector.shape_cast %173 : vector<2x1x42xf32> to vector<2x42xf32>
    %175 = vector.extract_strided_slice %153 {offsets = [0, 5, 0], sizes = [2, 1, 42], strides = [1, 1, 1]} : vector<2x8x42xf32> to vector<2x1x42xf32>
    %176 = vector.shape_cast %175 : vector<2x1x42xf32> to vector<2x42xf32>
    %177 = arith.maximumf %174, %176 : vector<2x42xf32>
    %c2_115 = arith.constant 2 : index
    %c0_116 = arith.constant 0 : index
    %c0_117 = arith.constant 0 : index
    %178 = vector.load %arg6[%c2_115, %c0_116, %c0_117] : memref<4x42x128xf32, #tpu.memory_space<vmem>>, vector<1x42x128xf32>
    %179 = vector.shape_cast %178 : vector<1x42x128xf32> to vector<42x128xf32>
    %cst_118 = arith.constant dense<0.000000e+00> : vector<2x128xf32>
    %180 = tpu.matmul %177, %179, %cst_118 {dimension_numbers = #tpu.dot_dimension_numbers<[1], [0], [0], [1], [0, 0, 1, 1], [], []>} : vector<2x42xf32>, vector<42x128xf32>, vector<2x128xf32> -> vector<2x128xf32>
    %181 = arith.addf %172, %180 : vector<2x128xf32>
    %182 = vector.extract_strided_slice %153 {offsets = [0, 6, 0], sizes = [2, 1, 42], strides = [1, 1, 1]} : vector<2x8x42xf32> to vector<2x1x42xf32>
    %183 = vector.shape_cast %182 : vector<2x1x42xf32> to vector<2x42xf32>
    %184 = vector.extract_strided_slice %153 {offsets = [0, 7, 0], sizes = [2, 1, 42], strides = [1, 1, 1]} : vector<2x8x42xf32> to vector<2x1x42xf32>
    %185 = vector.shape_cast %184 : vector<2x1x42xf32> to vector<2x42xf32>
    %186 = arith.maximumf %183, %185 : vector<2x42xf32>
    %c3_119 = arith.constant 3 : index
    %c0_120 = arith.constant 0 : index
    %c0_121 = arith.constant 0 : index
    %187 = vector.load %arg6[%c3_119, %c0_120, %c0_121] : memref<4x42x128xf32, #tpu.memory_space<vmem>>, vector<1x42x128xf32>
    %188 = vector.shape_cast %187 : vector<1x42x128xf32> to vector<42x128xf32>
    %cst_122 = arith.constant dense<0.000000e+00> : vector<2x128xf32>
    %189 = tpu.matmul %186, %188, %cst_122 {dimension_numbers = #tpu.dot_dimension_numbers<[1], [0], [0], [1], [0, 0, 1, 1], [], []>} : vector<2x42xf32>, vector<42x128xf32>, vector<2x128xf32> -> vector<2x128xf32>
    %190 = arith.addf %181, %189 : vector<2x128xf32>
    %c0_123 = arith.constant 0 : index
    %c0_124 = arith.constant 0 : index
    %191 = vector.load %arg7[%c0_123, %c0_124] : memref<1x128xf32, #tpu.memory_space<vmem>>, vector<1x128xf32>
    %192 = vector.broadcast %191 : vector<1x128xf32> to vector<2x128xf32>
    %193 = arith.addf %190, %192 : vector<2x128xf32>
    %c0_125 = arith.constant 0 : index
    %c0_126 = arith.constant 0 : index
    %c0_127 = arith.constant 0 : index
    %194 = vector.load %arg8[%c0_125, %c0_126, %c0_127] : memref<1x2x128xf32, #tpu.memory_space<vmem>>, vector<1x2x128xf32>
    %195 = vector.shape_cast %194 : vector<1x2x128xf32> to vector<2x128xf32>
    %196 = vector.shape_cast %193 : vector<2x128xf32> to vector<1x2x128xf32>
    tpu.vector_store %arg8[%c0_125, %c0_126, %c0_127], %196 {strides = array<i32>} : memref<1x2x128xf32, #tpu.memory_space<vmem>>, vector<1x2x128xf32>,
    return
  }
  func.func @transform_0(%arg0: i32) -> (i32, i32, i32) {
    %c0_i32 = arith.constant 0 : i32
    %c0_i32_0 = arith.constant 0 : i32
    %c0_i32_1 = arith.constant 0 : i32
    return %arg0, %c0_i32, %c0_i32_0 : i32, i32, i32
  }
  func.func @transform_1(%arg0: i32) -> (i32, i32, i32) {
    %c0_i32 = arith.constant 0 : i32
    %c0_i32_0 = arith.constant 0 : i32
    %c0_i32_1 = arith.constant 0 : i32
    %c0_i32_2 = arith.constant 0 : i32
    return %c0_i32, %c0_i32_0, %c0_i32_1 : i32, i32, i32
  }
  func.func @transform_2(%arg0: i32) -> (i32, i32) {
    %c0_i32 = arith.constant 0 : i32
    %c0_i32_0 = arith.constant 0 : i32
    %c0_i32_1 = arith.constant 0 : i32
    return %c0_i32, %c0_i32_0 : i32, i32
  }
  func.func @transform_3(%arg0: i32) -> (i32, i32, i32) {
    %c0_i32 = arith.constant 0 : i32
    %c0_i32_0 = arith.constant 0 : i32
    %c0_i32_1 = arith.constant 0 : i32
    %c0_i32_2 = arith.constant 0 : i32
    return %c0_i32, %c0_i32_0, %c0_i32_1 : i32, i32, i32
  }
  func.func @transform_4(%arg0: i32) -> (i32, i32) {
    %c0_i32 = arith.constant 0 : i32
    %c0_i32_0 = arith.constant 0 : i32
    %c0_i32_1 = arith.constant 0 : i32
    return %c0_i32, %c0_i32_0 : i32, i32
  }
  func.func @transform_5(%arg0: i32) -> (i32, i32, i32) {
    %c0_i32 = arith.constant 0 : i32
    %c0_i32_0 = arith.constant 0 : i32
    %c0_i32_1 = arith.constant 0 : i32
    %c0_i32_2 = arith.constant 0 : i32
    return %c0_i32, %c0_i32_0, %c0_i32_1 : i32, i32, i32
  }
  func.func @transform_6(%arg0: i32) -> (i32, i32) {
    %c0_i32 = arith.constant 0 : i32
    %c0_i32_0 = arith.constant 0 : i32
    %c0_i32_1 = arith.constant 0 : i32
    return %c0_i32, %c0_i32_0 : i32, i32
  }
  func.func @transform_7(%arg0: i32) -> (i32, i32, i32) {
    %c0_i32 = arith.constant 0 : i32
    %c0_i32_0 = arith.constant 0 : i32
    %c0_i32_1 = arith.constant 0 : i32
    return %arg0, %c0_i32, %c0_i32_0 : i32, i32, i32
  }
}

</mosaic_0001>

<bundles_post_ra>
// kernel: tpu_custom_call.1
= control target key start
LH: loop header
LB: loop body
LE: loop exit
PB: predicated region body
PF: predicated region fallthrough
CT: control target
= control target key end

     0   :  { %vm27_vm0 = vcmask 517120   ;;  %v2813_v7 = vmov 0.0   ;;  %vm46_vm1 = vcmask 523264   ;;  %s3985_s0 = inlined_call_operand.vmem [shape: f32[2,16,64], index: 0, kind: input, shape index: {}]   ;;  %s3986_s1 = inlined_call_operand.vmem [shape: f32[5,64,256], index: 1, kind: input, shape index: {}]   ;;  %s3987_s2 = inlined_call_operand.vmem [shape: f32[1,256], index: 2, kind: input, shape index: {}]   ;;  %s3988_s3 = inlined_call_operand.vmem [shape: f32[5,240,48], index: 3, kind: input, shape index: {}]   ;;  %s3989_s4 = inlined_call_operand.vmem [shape: f32[1,48], index: 4, kind: input, shape index: {}]   ;;  %s3990_s5 = inlined_call_operand.vmem [shape: f32[4,42,128], index: 5, kind: input, shape index: {}]   ;;  %s3991_s6 = inlined_call_operand.vmem [shape: f32[1,128], index: 6, kind: input, shape index: {}]   ;;  %s3992_s7 = inlined_call_operand.hbm [shape: f32[1,2,128], index: 7, kind: output, shape index: {}]  }
   0x1   :  { %v2075_v0 = vld [vmem:[%s3986_s1 + $0x88] sm:$0xff]  ;;  %v2077_v1 = vld [vmem:[%s3986_s1 + $0x98] sm:$0xff]  ;;  %v2074_v2 = vld [vmem:[%s3986_s1 + $0x80] sm:$0xff]  ;;  %168 = vmatprep.mubr.f32.mxu0 %v2813_v7  ;;  %32 = vst [vmem:[#allocation3] sm:$0xc0] %v2813_v7 }
   0x2   :  { %v2404_v3 = vpack.c.bf16 %v2077_v1, %v2075_v0  ;;  %v2076_v4 = vld [vmem:[%s3986_s1 + $0x90] sm:$0xff]  ;;  %v2079_v5 = vld [vmem:[%s3986_s1 + $0xa8] sm:$0xff]  ;;  %v2081_v6 = vld [vmem:[%s3986_s1 + $0xb8] sm:$0xff]  ;;  %35 = vst [vmem:[#allocation3 + $0x30] sm:$0xc0] %v2813_v7 }
   0x3   :  { %37 = vst [vmem:[#allocation3 + $0x20] sm:$0x3] %v2813_v7  ;;  %40 = vst [vmem:[#allocation3 + $0x50] sm:$0x3] %v2813_v7  ;;  %v2406_v8 = vpack.c.bf16 %v2076_v4, %v2074_v2  ;;  %v2408_v9 = vpack.c.bf16 %v2081_v6, %v2079_v5  ;;  %v2078_v10 = vld [vmem:[%s3986_s1 + $0xa0] sm:$0xff]  ;;  %v2080_v11 = vld [vmem:[%s3986_s1 + $0xb0] sm:$0xff] }
   0x4   :  { %28 = vst.msk [vmem:[#allocation2 + $0x6] sm:$0x3] %vm27_vm0, %v2813_v7  ;;  %29 = vst.msk [vmem:[#allocation2 + $0x26] sm:$0x3] %vm27_vm0, %v2813_v7  ;;  %v2083_v12 = vld [vmem:[%s3986_s1 + $0xc8] sm:$0xff]  ;;  %2405 = vmatprep.subr.bf16.mxu0 %v2404_v3  ;;  %v2085_v13 = vld [vmem:[%s3986_s1 + $0xd8] sm:$0xff]  ;;  %v2410_v14 = vpack.c.bf16 %v2080_v11, %v2078_v10 }
   0x5   :  { %30 = vst.msk [vmem:[#allocation2 + $0x18] sm:$0x3] %vm27_vm0, %v2813_v7  ;;  %31 = vst.msk [vmem:[#allocation2 + $0x38] sm:$0x3] %vm27_vm0, %v2813_v7  ;;  %2407 = vmatpush1.bf16.msra.mxu0 %v2406_v8  ;;  %v2412_v15 = vpack.c.bf16 %v2085_v13, %v2083_v12  ;;  %v2082_v16 = vld [vmem:[%s3986_s1 + $0xc0] sm:$0xff]  ;;  %v2084_v17 = vld [vmem:[%s3986_s1 + $0xd0] sm:$0xff] }
   0x6   :  { %2409 = vmatprep.subr.bf16.mxu0 %v2408_v9  ;;  %v42_v18 = vld [vmem:[%s3985_s0] sm:$0xff]  ;;  %v2087_v19 = vld [vmem:[%s3986_s1 + $0xe8] sm:$0xff]  ;;  %v2089_v20 = vld [vmem:[%s3986_s1 + $0xf8] sm:$0xff]  ;;  %v2414_v22 = vpack.c.bf16 %v2084_v17, %v2082_v16 }
   0x7   :  { %47 = vst.msk [vmem:[#allocation2 + $0x8] sm:$0xff] %vm46_vm1, %v42_v18  ;;  %v43_v21 = vld [vmem:[%s3985_s0 + $0x8] sm:$0xff]  ;;  %v44_v23 = vld [vmem:[%s3985_s0 + $0x10] sm:$0xff]  ;;  %v2416_v24 = vpack.c.bf16 %v2089_v20, %v2087_v19  ;;  %v2086_v25 = vld [vmem:[%s3986_s1 + $0xe0] sm:$0xff] }
   0x8   :  { %48 = vst.msk [vmem:[#allocation2 + $0x10] sm:$0xff] %vm46_vm1, %v43_v21  ;;  %v2088_v26 = vld [vmem:[%s3986_s1 + $0xf0] sm:$0xff]  ;;  %49 = vst.msk [vmem:[#allocation2 + $0x28] sm:$0xff] %vm46_vm1, %v44_v23  ;;  %v56_v27 = vld [vmem:[%s3986_s1 + $0x8] sm:$0xff] }
   0x9   :  { %2411 = vmatpush1.bf16.msra.mxu0 %v2410_v14  ;;  %v58_v28 = vld [vmem:[%s3986_s1 + $0x18] sm:$0xff]  ;;  %v2418_v30 = vpack.c.bf16 %v2088_v26, %v2086_v25  ;;  %v55_v32 = vld [vmem:[%s3986_s1] sm:$0xff]  ;;  %v57_v33 = vld [vmem:[%s3986_s1 + $0x10] sm:$0xff] }
   0xa   :  { %2413 = vmatprep.subr.bf16.mxu0 %v2412_v15  ;;  %v45_v29 = vld [vmem:[%s3985_s0 + $0x18] sm:$0xff]  ;;  %v2420_v31 = vpack.c.bf16 %v58_v28, %v56_v27  ;;  %v60_v34 = vld [vmem:[%s3986_s1 + $0x28] sm:$0xff]  ;;  %v2422_v37 = vpack.c.bf16 %v57_v33, %v55_v32  ;;  %v59_v39 = vld [vmem:[%s3986_s1 + $0x20] sm:$0xff] }
   0xb   :  { %50 = vst.msk [vmem:[#allocation2 + $0x30] sm:$0xff] %vm46_vm1, %v45_v29  ;;  %v62_v35 = vld [vmem:[%s3986_s1 + $0x38] sm:$0xff]  ;;  %v61_v40 = vld [vmem:[%s3986_s1 + $0x30] sm:$0xff]  ;;  %v64_v41 = vld [vmem:[%s3986_s1 + $0x48] sm:$0xff] }
   0xc   :  { %v2424_v38 = vpack.c.bf16 %v62_v35, %v60_v34  ;;  %v66_v42 = vld [vmem:[%s3986_s1 + $0x58] sm:$0xff]  ;;  %v2426_v44 = vpack.c.bf16 %v61_v40, %v59_v39  ;;  %v63_v46 = vld [vmem:[%s3986_s1 + $0x40] sm:$0xff]  ;;  %v65_v47 = vld [vmem:[%s3986_s1 + $0x50] sm:$0xff] }
   0xd   :  { %2415 = vmatpush1.bf16.msra.mxu0 %v2414_v22  ;;  %v2428_v45 = vpack.c.bf16 %v66_v42, %v64_v41  ;;  %v68_v48 = vld [vmem:[%s3986_s1 + $0x68] sm:$0xff]  ;;  %v70_v49 = vld [vmem:[%s3986_s1 + $0x78] sm:$0xff]  ;;  %v2430_v51 = vpack.c.bf16 %v65_v47, %v63_v46  ;;  %v67_v53 = vld [vmem:[%s3986_s1 + $0x60] sm:$0xff] }
   0xe   :  { %2417 = vmatprep.subr.bf16.mxu0 %v2416_v24  ;;  %v71_v36 = vld [vmem:[#allocation2 + $0x7] sm:$0xff]  ;;  %v2432_v52 = vpack.c.bf16 %v70_v49, %v68_v48  ;;  %v69_v54 = vld [vmem:[%s3986_s1 + $0x70] sm:$0xff]  ;;  %v2101_v56 = vld [vmem:[%s3986_s1 + $0x118] sm:$0xff] }
   0xf   :  { %v72_v43 = vld [vmem:[#allocation2 + $0xf] sm:$0xff]  ;;  %v73_v50 = vld [vmem:[#allocation2 + $0x27] sm:$0xff]  ;;  %v2434_v58 = vpack.c.bf16 %v69_v54, %v67_v53  ;;  %v2105_v63 = vld [vmem:[%s3986_s1 + $0x138] sm:$0xff] }
  0x10   :  { %v2099_v55 = vld [vmem:[%s3986_s1 + $0x108] sm:$0xff]  ;;  %v2098_v60 = vld [vmem:[%s3986_s1 + $0x100] sm:$0xff]  ;;  %v2100_v61 = vld [vmem:[%s3986_s1 + $0x110] sm:$0xff] }
  0x11   :  { %2419 = vmatpush1.bf16.msra.mxu0 %v2418_v30  ;;  %v2436_v59 = vpack.c.bf16 %v2101_v56, %v2099_v55  ;;  %v2103_v62 = vld [vmem:[%s3986_s1 + $0x128] sm:$0xff]  ;;  %v2438_v1 = vpack.c.bf16 %v2100_v61, %v2098_v60  ;;  %v2102_v3 = vld [vmem:[%s3986_s1 + $0x120] sm:$0xff]  ;;  %v2104_v4 = vld [vmem:[%s3986_s1 + $0x130] sm:$0xff] }
  0x12   :  { %2421 = vmatprep.subr.bf16.mxu0 %v2420_v31  ;;  %v74_v57 = vld [vmem:[#allocation2 + $0x2f] sm:$0xff]  ;;  %v51_v0 = vld [vmem:[#allocation2 + $0x6] sm:$0xff]  ;;  %v2440_v2 = vpack.c.bf16 %v2105_v63, %v2103_v62  ;;  %v2109_v6 = vld [vmem:[%s3986_s1 + $0x158] sm:$0xff] }
  0x13   :  { %v2107_v5 = vld [vmem:[%s3986_s1 + $0x148] sm:$0xff] }
  0x14   :  { %2090 = vmatmul.mubr.msk.f32.vlgmr.msra.gmra.mrb[0].mxu0 %vm46_vm1, %v71_v36 }
  0x15   :  { %2423 = vmatpush1.bf16.msra.mxu0 %v2422_v37  ;;  %174 = vmatprep.mubr.f32.mxu0 %v2813_v7 }
  0x16   :  { %2425 = vmatprep.subr.bf16.mxu0 %v2424_v38 }
  0x18   :  { %2091 = vmatmul.mubr.msk.f32.gmra.mrb[2].mxu0 %vm46_vm1, %v72_v43 }
  0x19   :  { %2427 = vmatpush1.bf16.msra.mxu0 %v2426_v44  ;;  %180 = vmatprep.mubr.f32.mxu0 %v2813_v7 }
  0x1a   :  { %2429 = vmatprep.subr.bf16.mxu0 %v2428_v45 }
  0x1c   :  { %2092 = vmatmul.mubr.msk.f32.gmra.mrb[4].mxu0 %vm46_vm1, %v73_v50 }
  0x1d   :  { %2431 = vmatpush1.bf16.msra.mxu0 %v2430_v51  ;;  %186 = vmatprep.mubr.f32.mxu0 %v2813_v7 }
  0x1e   :  { %2433 = vmatprep.subr.bf16.mxu0 %v2432_v52 }
  0x20   :  { %2093 = vmatmul.mubr.msk.f32.gmra.mrb[6].mxu0 %vm46_vm1, %v74_v57 }
  0x21   :  { %2435 = vmatpush1.bf16.msra.mxu0 %v2434_v58  ;;  %269 = vmatprep.mubr.f32.mxu0 %v2813_v7 }
  0x22   :  { %2437 = vmatprep.subr.bf16.mxu0 %v2436_v59 }
  0x23   :  { %12 = vsyncpa [#allocation5], 0  ;;  %v52_v8 = vld [vmem:[#allocation2 + $0xe] sm:$0xff]  ;;  %v2442_v9 = vpack.c.bf16 %v2104_v4, %v2102_v3  ;;  %v2444_v10 = vpack.c.bf16 %v2109_v6, %v2107_v5  ;;  %v2106_v11 = vld [vmem:[%s3986_s1 + $0x140] sm:$0xff]  ;;  %s2815_s11 = smov 112   ;;  %vm33_vm2 = vcmask 916486  }
  0x24   :  { %2094 = vmatmul.mubr.msk.f32.vlgmr.msra.gmra.mrb[0].mxu0 %vm46_vm1, %v51_v0  ;;  %v2108_v12 = vld [vmem:[%s3986_s1 + $0x150] sm:$0xff]  ;;  %v2111_v13 = vld [vmem:[%s3986_s1 + $0x168] sm:$0xff]  ;;  %v2113_v14 = vld [vmem:[%s3986_s1 + $0x178] sm:$0xff]  ;;  %34 = vst.msk [vmem:[#allocation3 + $0x8] sm:$0xc0] %vm33_vm2, %v2813_v7  ;;  %vm38_vm3 = vcmask 910336  }
  0x25   :  { %2439 = vmatpush1.bf16.msra.mxu0 %v2438_v1  ;;  %275 = vmatprep.mubr.f32.mxu0 %v2813_v7  ;;  %v53_v15 = vld [vmem:[#allocation2 + $0x26] sm:$0xff]  ;;  %v2446_v16 = vpack.c.bf16 %v2108_v12, %v2106_v11  ;;  %v2448_v17 = vpack.c.bf16 %v2113_v14, %v2111_v13  ;;  %v2112_v19 = vld [vmem:[%s3986_s1 + $0x170] sm:$0xff]  ;;  %v2121_v21 = vld [vmem:[%s3986_s1 + $0x198] sm:$0xff]  ;;  %36 = vst.msk [vmem:[#allocation3 + $0x38] sm:$0xc0] %vm33_vm2, %v2813_v7  ;;  %vm736_vm4 = vcmask 916480  }
  0x26   :  { %2441 = vmatprep.subr.bf16.mxu0 %v2440_v2  ;;  %v2110_v18 = vld [vmem:[%s3986_s1 + $0x160] sm:$0xff]  ;;  %v2119_v20 = vld [vmem:[%s3986_s1 + $0x188] sm:$0xff]  ;;  %v2120_v26 = vld [vmem:[%s3986_s1 + $0x190] sm:$0xff]  ;;  %39 = vst.msk [vmem:[#allocation3 + $0x28] sm:$0x3] %vm38_vm3, %v2813_v7  ;;  %vm1070_vm6 = vcmask 1040384  }
  0x27   :  { %v54_v22 = vld [vmem:[#allocation2 + $0x2e] sm:$0xff]  ;;  %v2450_v23 = vpack.c.bf16 %v2112_v19, %v2110_v18  ;;  %v2452_v24 = vpack.c.bf16 %v2121_v21, %v2119_v20  ;;  %v2118_v25 = vld [vmem:[%s3986_s1 + $0x180] sm:$0xff]  ;;  %v2125_v28 = vld [vmem:[%s3986_s1 + $0x1b8] sm:$0xff]  ;;  %41 = vst.msk [vmem:[#allocation3 + $0x58] sm:$0x3] %vm38_vm3, %v2813_v7  ;;  %vm1551_vm7 = vcmask 1045504  }
  0x28   :  { %2095 = vmatmul.mubr.msk.f32.gmra.mrb[2].mxu0 %vm46_vm1, %v52_v8  ;;  %v2123_v27 = vld [vmem:[%s3986_s1 + $0x1a8] sm:$0xff]  ;;  %v2454_v30 = vpack.c.bf16 %v2120_v26, %v2118_v25  ;;  %v2122_v32 = vld [vmem:[%s3986_s1 + $0x1a0] sm:$0xff]  ;;  %v2124_v33 = vld [vmem:[%s3986_s1 + $0x1b0] sm:$0xff]  ;;  %vm1009_vm8 = vcmask 1041408   ;;  %vm1408_vm9 = vcmask 1046528   ;;  %vm2817_vm10 = vmmov 1  }
  0x29   :  { %2443 = vmatpush1.bf16.msra.mxu0 %v2442_v9  ;;  %281 = vmatprep.mubr.f32.mxu0 %v2813_v7  ;;  %v294_v29 = vld [vmem:[#allocation2 + $0x8] sm:$0xff]  ;;  %v2456_v31 = vpack.c.bf16 %v2125_v28, %v2123_v27  ;;  %v2129_v35 = vld [vmem:[%s3986_s1 + $0x1d8] sm:$0xff]  ;;  %v295_v36 = vld [vmem:[#allocation2 + $0x10] sm:$0xff]  ;;  %v2458_v37 = vpack.c.bf16 %v2124_v33, %v2122_v32  ;;  %vm2818_vm12 = vmmov 0   ;;  %s2819_s19 = smov 122   ;;  %vm1724_vm13 = vcmask 1041409  }
  0x2a   :  { %2445 = vmatprep.subr.bf16.mxu0 %v2444_v10  ;;  %v2127_v34 = vld [vmem:[%s3986_s1 + $0x1c8] sm:$0xff]  ;;  %v2126_v39 = vld [vmem:[%s3986_s1 + $0x1c0] sm:$0xff]  ;;  %v2128_v40 = vld [vmem:[%s3986_s1 + $0x1d0] sm:$0xff]  ;;  %vm1726_vm14 = vcmask 343040   ;;  %s2820_s17 = smov [#allocation4]  }
  0x2b   :  { %v2460_v38 = vpack.c.bf16 %v2129_v35, %v2127_v34  ;;  %v2131_v41 = vld [vmem:[%s3986_s1 + $0x1e8] sm:$0xff]  ;;  %v2133_v42 = vld [vmem:[%s3986_s1 + $0x1f8] sm:$0xff]  ;;  %v2462_v44 = vpack.c.bf16 %v2128_v40, %v2126_v39  ;;  %v2130_v46 = vld [vmem:[%s3986_s1 + $0x1e0] sm:$0xff]  ;;  %s2066_s18 = sshll.u32 %s2820_s17, 4  ;;  %s2067_s18 = int_to_ptr.vmem [resolvable:$true] %s2066_s18 }
  0x2c   :  { %2096 = vmatmul.mubr.msk.f32.gmra.mrb[4].mxu0 %vm46_vm1, %v53_v15  ;;  %v296_v43 = vld [vmem:[#allocation2 + $0x28] sm:$0xff]  ;;  %v2464_v45 = vpack.c.bf16 %v2133_v42, %v2131_v41  ;;  %v2132_v47 = vld [vmem:[%s3986_s1 + $0x1f0] sm:$0xff]  ;;  %v2141_v49 = vld [vmem:[%s3986_s1 + $0x218] sm:$0xff]  ;;  %p2794_p1 = scmp.lt.s32.totalorder %s2067_s18, %s2067_s18 }
  0x2d   :  { %2447 = vmatpush1.bf16.msra.mxu0 %v2446_v16  ;;  %287 = vmatprep.mubr.f32.mxu0 %v2813_v7  ;;  %v2139_v48 = vld [vmem:[%s3986_s1 + $0x208] sm:$0xff]  ;;  %v297_v50 = vld [vmem:[#allocation2 + $0x30] sm:$0xff]  ;;  %v2466_v51 = vpack.c.bf16 %v2132_v47, %v2130_v46  ;;  %v2138_v53 = vld [vmem:[%s3986_s1 + $0x200] sm:$0xff] }
  0x2e   :  { %2449 = vmatprep.subr.bf16.mxu0 %v2448_v17  ;;  %v2468_v52 = vpack.c.bf16 %v2141_v49, %v2139_v48  ;;  %v2140_v54 = vld [vmem:[%s3986_s1 + $0x210] sm:$0xff]  ;;  %v2143_v55 = vld [vmem:[%s3986_s1 + $0x228] sm:$0xff]  ;;  %v2145_v56 = vld [vmem:[%s3986_s1 + $0x238] sm:$0xff] }
  0x2f   :  { %v424_v57 = vld [vmem:[#allocation2 + $0x9] sm:$0xff]  ;;  %v2470_v58 = vpack.c.bf16 %v2140_v54, %v2138_v53  ;;  %v2472_v59 = vpack.c.bf16 %v2145_v56, %v2143_v55  ;;  %v2142_v60 = vld [vmem:[%s3986_s1 + $0x220] sm:$0xff]  ;;  %v2149_v63 = vld [vmem:[%s3986_s1 + $0x258] sm:$0xff] }
  0x30   :  { %2097 = vmatmul.mubr.msk.f32.gmra.mrb[6].mxu0 %vm46_vm1, %v54_v22  ;;  %v2144_v61 = vld [vmem:[%s3986_s1 + $0x230] sm:$0xff]  ;;  %v2147_v62 = vld [vmem:[%s3986_s1 + $0x248] sm:$0xff]  ;;  %v2146_v3 = vld [vmem:[%s3986_s1 + $0x240] sm:$0xff]  ;;  %v2814_v22 = vmov 0.0|0.0  }
  0x31   :  { %2451 = vmatpush1.bf16.msra.mxu0 %v2450_v23  ;;  %391 = vmatprep.mubr.f32.mxu0 %v2813_v7  ;;  %v425_v0 = vld [vmem:[#allocation2 + $0x11] sm:$0xff]  ;;  %v2474_v1 = vpack.c.bf16 %v2144_v61, %v2142_v60  ;;  %v2476_v2 = vpack.c.bf16 %v2149_v63, %v2147_v62  ;;  %v2151_v5 = vld [vmem:[%s3986_s1 + $0x268] sm:$0xff]  ;;  %v2150_v11 = vld [vmem:[%s3986_s1 + $0x260] sm:$0xff]  ;;  %v686_v62 = vlaneseq }
  0x32   :  { %2453 = vmatprep.subr.bf16.mxu0 %v2452_v24  ;;  %v2148_v4 = vld [vmem:[%s3986_s1 + $0x250] sm:$0xff]  ;;  %v2153_v6 = vld [vmem:[%s3986_s1 + $0x278] sm:$0xff]  ;;  %v2192_v19 = vld [vmem:[%s3988_s3 + $0x1e0] sm:$0xff]  ;;  %2484 = vmatprep.subr.bf16.mxu1 %v2814_v22 }
  0x33   :  { %v426_v8 = vld [vmem:[#allocation2 + $0x29] sm:$0xff]  ;;  %v2478_v9 = vpack.c.bf16 %v2148_v4, %v2146_v3  ;;  %v2480_v10 = vpack.c.bf16 %v2153_v6, %v2151_v5  ;;  %v427_v13 = vld [vmem:[#allocation2 + $0x31] sm:$0xff]  ;;  %v2160_v28 = vld [vmem:[%s3988_s3 + $0x100] sm:$0xff]  ;;  %v3266_v63 = vshrl.u32 %v686_v62, 7  ;;  %vm3462_vm5 = vcmp.lt.s32.totalorder %v686_v62, 240 }
  0x34   :  { %2114 = vmatmul.mubr.msk.f32.vlgmr.msra.gmra.mrb[0].mxu0 %vm46_vm1, %v294_v29  ;;  %v2152_v12 = vld [vmem:[%s3986_s1 + $0x270] sm:$0xff]  ;;  %v2193_v20 = vld [vmem:[%s3988_s3 + $0x1e8] sm:$0xff]  ;;  %v2159_v24 = vld [vmem:[%s3988_s3 + $0xf8] sm:$0xff] }
  0x35   :  { %2455 = vmatpush1.bf16.msra.mxu0 %v2454_v30  ;;  %397 = vmatprep.mubr.f32.mxu0 %v2813_v7  ;;  %v2482_v14 = vpack.c.bf16 %v2152_v12, %v2150_v11  ;;  %v554_v15 = vld [vmem:[#allocation2 + $0xa] sm:$0xff]  ;;  %v555_v16 = vld [vmem:[#allocation2 + $0x12] sm:$0xff]  ;;  %v2575_v23 = vpack.c.bf16 %v2193_v20, %v2192_v19  ;;  %v2196_v32 = vld [vmem:[%s3988_s3 + $0x200] sm:$0xff]  ;;  %v688_v6 = vsub.s32 0, %v3266_v63  ;;  %v692_v12 = vsub.s32 1, %v3266_v63 }
  0x36   :  { %2457 = vmatprep.subr.bf16.mxu0 %v2456_v31  ;;  %v556_v17 = vld [vmem:[#allocation2 + $0x2a] sm:$0xff]  ;;  %v557_v18 = vld [vmem:[#allocation2 + $0x32] sm:$0xff]  ;;  %v2164_v40 = vld [vmem:[%s3988_s3 + $0x120] sm:$0xff] }
  0x37   :  { %v2158_v21 = vld [vmem:[%s3988_s3 + $0xf0] sm:$0xff]  ;;  %v2195_v26 = vld [vmem:[%s3988_s3 + $0x1f8] sm:$0xff]  ;;  %v2161_v29 = vld [vmem:[%s3988_s3 + $0x108] sm:$0xff] }
  0x38   :  { %2115 = vmatmul.mubr.msk.f32.gmra.mrb[2].mxu0 %vm46_vm1, %v295_v36  ;;  %v2194_v25 = vld [vmem:[%s3988_s3 + $0x1f0] sm:$0xff]  ;;  %v2485_v27 = vpack.c.bf16 %v2159_v24, %v2158_v21  ;;  %v2488_v31 = vpack.c.bf16 %v2161_v29, %v2160_v28  ;;  %v2197_v33 = vld [vmem:[%s3988_s3 + $0x208] sm:$0xff]  ;;  %v2163_v35 = vld [vmem:[%s3988_s3 + $0x118] sm:$0xff] }
  0x39   :  { %2459 = vmatpush1.bf16.msra.mxu0 %v2458_v37  ;;  %403 = vmatprep.mubr.f32.mxu0 %v2813_v7  ;;  %v2578_v30 = vpack.c.bf16 %v2195_v26, %v2194_v25  ;;  %v2162_v34 = vld [vmem:[%s3988_s3 + $0x110] sm:$0xff]  ;;  %v2581_v36 = vpack.c.bf16 %v2197_v33, %v2196_v32  ;;  %v2199_v39 = vld [vmem:[%s3988_s3 + $0x218] sm:$0xff]  ;;  %v2165_v41 = vld [vmem:[%s3988_s3 + $0x128] sm:$0xff] }
  0x3a   :  { %2461 = vmatprep.subr.bf16.mxu0 %v2460_v38  ;;  %2486 = vmatpush1.bf16.msra.mxu1 %v2485_v27  ;;  %v2491_v37 = vpack.c.bf16 %v2163_v35, %v2162_v34  ;;  %v2198_v38 = vld [vmem:[%s3988_s3 + $0x210] sm:$0xff]  ;;  %v2167_v47 = vld [vmem:[%s3988_s3 + $0x138] sm:$0xff]  ;;  %v2169_v53 = vld [vmem:[%s3988_s3 + $0x148] sm:$0xff] }
  0x3b   :  { %2487 = vmatprep.subr.bf16.mxu1 %v2814_v22  ;;  %v2584_v42 = vpack.c.bf16 %v2199_v39, %v2198_v38  ;;  %v2166_v46 = vld [vmem:[%s3988_s3 + $0x130] sm:$0xff]  ;;  %v2204_v56 = vld [vmem:[%s3988_s3 + $0x240] sm:$0xff]  ;;  %v2173_v4 = vld [vmem:[%s3988_s3 + $0x168] sm:$0xff] }
  0x3c   :  { %2116 = vmatmul.mubr.msk.f32.gmra.mrb[4].mxu0 %vm46_vm1, %v296_v43  ;;  %v2494_v43 = vpack.c.bf16 %v2165_v41, %v2164_v40  ;;  %v2497_v49 = vpack.c.bf16 %v2167_v47, %v2166_v46  ;;  %v2172_v3 = vld [vmem:[%s3988_s3 + $0x160] sm:$0xff]  ;;  %v2177_v24 = vld [vmem:[%s3988_s3 + $0x188] sm:$0xff]  ;;  %v2214_v39 = vld [vmem:[%s3988_s3 + $0x290] sm:$0xff] }
  0x3d   :  { %2463 = vmatpush1.bf16.msra.mxu0 %v2462_v44  ;;  %409 = vmatprep.mubr.f32.mxu0 %v2813_v7  ;;  %v2200_v44 = vld [vmem:[%s3988_s3 + $0x220] sm:$0xff]  ;;  %v2506_v5 = vpack.c.bf16 %v2173_v4, %v2172_v3  ;;  %v2213_v29 = vld [vmem:[%s3988_s3 + $0x288] sm:$0xff]  ;;  %v2215_v40 = vld [vmem:[%s3988_s3 + $0x298] sm:$0xff] }
  0x3e   :  { %2465 = vmatprep.subr.bf16.mxu0 %v2464_v45  ;;  %2489 = vmatpush1.bf16.msra.mxu1 %v2488_v31  ;;  %v2201_v45 = vld [vmem:[%s3988_s3 + $0x228] sm:$0xff]  ;;  %v2212_v28 = vld [vmem:[%s3988_s3 + $0x280] sm:$0xff]  ;;  %v2219_v3 = vld [vmem:[%s3988_s3 + $0x2b8] sm:$0xff] }
  0x3f   :  { %2490 = vmatprep.subr.bf16.mxu1 %v2814_v22  ;;  %v2587_v48 = vpack.c.bf16 %v2201_v45, %v2200_v44  ;;  %v2605_v32 = vpack.c.bf16 %v2213_v29, %v2212_v28  ;;  %v2608_v44 = vpack.c.bf16 %v2215_v40, %v2214_v39  ;;  %vm3900_vm11 = vmpackc.low %vm1009_vm8, %vm2817_vm10 }
  0x40   :  { %2117 = vmatmul.mubr.msk.f32.gmra.mrb[6].mxu0 %vm46_vm1, %v297_v50  ;;  %v2202_v50 = vld [vmem:[%s3988_s3 + $0x230] sm:$0xff] }
  0x41   :  { %2467 = vmatpush1.bf16.msra.mxu0 %v2466_v51  ;;  %521 = vmatprep.mubr.f32.mxu0 %v2813_v7  ;;  %v2203_v51 = vld [vmem:[%s3988_s3 + $0x238] sm:$0xff] }
  0x42   :  { %2469 = vmatprep.subr.bf16.mxu0 %v2468_v52  ;;  %2492 = vmatpush1.bf16.msra.mxu1 %v2491_v37  ;;  %v2168_v52 = vld [vmem:[%s3988_s3 + $0x140] sm:$0xff]  ;;  %v2590_v54 = vpack.c.bf16 %v2203_v51, %v2202_v50  ;;  %v2179_v37 = vld [vmem:[%s3988_s3 + $0x198] sm:$0xff] }
  0x43   :  { %2493 = vmatprep.subr.bf16.mxu1 %v2814_v22  ;;  %v2500_v55 = vpack.c.bf16 %v2169_v53, %v2168_v52  ;;  %v2216_v52 = vld [vmem:[%s3988_s3 + $0x2a0] sm:$0xff]  ;;  %v2217_v53 = vld [vmem:[%s3988_s3 + $0x2a8] sm:$0xff] }
  0x44   :  { %2134 = vmatmul.mubr.msk.f32.vlgmr.msra.gmra.mrb[0].mxu0 %vm46_vm1, %v424_v57  ;;  %v2205_v57 = vld [vmem:[%s3988_s3 + $0x248] sm:$0xff] }
  0x45   :  { %2471 = vmatpush1.bf16.msra.mxu0 %v2470_v58  ;;  %527 = vmatprep.mubr.f32.mxu0 %v2813_v7  ;;  %v2170_v58 = vld [vmem:[%s3988_s3 + $0x150] sm:$0xff]  ;;  %v2593_v60 = vpack.c.bf16 %v2205_v57, %v2204_v56  ;;  %v2611_v56 = vpack.c.bf16 %v2217_v53, %v2216_v52 }
  0x46   :  { %2473 = vmatprep.subr.bf16.mxu0 %v2472_v59  ;;  %2495 = vmatpush1.bf16.msra.mxu1 %v2494_v43  ;;  %v2171_v59 = vld [vmem:[%s3988_s3 + $0x158] sm:$0xff] }
  0x47   :  { %2496 = vmatprep.subr.bf16.mxu1 %v2814_v22  ;;  %v2503_v61 = vpack.c.bf16 %v2171_v59, %v2170_v58 }
  0x48   :  { %2135 = vmatmul.mubr.msk.f32.gmra.mrb[2].mxu0 %vm46_vm1, %v425_v0  ;;  %v2206_v0 = vld [vmem:[%s3988_s3 + $0x250] sm:$0xff] }
  0x49   :  { %2475 = vmatpush1.bf16.msra.mxu0 %v2474_v1  ;;  %533 = vmatprep.mubr.f32.mxu0 %v2813_v7  ;;  %v2207_v1 = vld [vmem:[%s3988_s3 + $0x258] sm:$0xff] }
  0x4a   :  { %2477 = vmatprep.subr.bf16.mxu0 %v2476_v2  ;;  %2498 = vmatpush1.bf16.msra.mxu1 %v2497_v49  ;;  %v2596_v2 = vpack.c.bf16 %v2207_v1, %v2206_v0  ;;  %v2181_v49 = vld [vmem:[%s3988_s3 + $0x1a8] sm:$0xff] }
  0x4b   :  { %2499 = vmatprep.subr.bf16.mxu1 %v2814_v22 }
  0x4c   :  { %2136 = vmatmul.mubr.msk.f32.gmra.mrb[4].mxu0 %vm46_vm1, %v426_v8  ;;  %v2208_v8 = vld [vmem:[%s3988_s3 + $0x260] sm:$0xff] }
  0x4d   :  { %2479 = vmatpush1.bf16.msra.mxu0 %v2478_v9  ;;  %539 = vmatprep.mubr.f32.mxu0 %v2813_v7  ;;  %v2209_v9 = vld [vmem:[%s3988_s3 + $0x268] sm:$0xff] }
  0x4e   :  { %2481 = vmatprep.subr.bf16.mxu0 %v2480_v10  ;;  %2501 = vmatpush1.bf16.msra.mxu1 %v2500_v55  ;;  %v684_v10 = vld [vmem:[%s3987_s2] sm:$0x3]  ;;  %v2599_v11 = vpack.c.bf16 %v2209_v9, %v2208_v8  ;;  %v2185_v9 = vld [vmem:[%s3988_s3 + $0x1c8] sm:$0xff] }
  0x4f   :  { %2502 = vmatprep.subr.bf16.mxu1 %v2814_v22  ;;  %v3306_v20 = vrot.slane %v684_v10, %v692_v12  ;;  %v2184_v8 = vld [vmem:[%s3988_s3 + $0x1c0] sm:$0xff]  ;;  %v2221_v12 = vld [vmem:[%s3988_s3 + $0x2c8] sm:$0xff] }
  0x50   :  { %2137 = vmatmul.mubr.msk.f32.gmra.mrb[6].mxu0 %vm46_vm1, %v427_v13  ;;  %v2174_v13 = vld [vmem:[%s3988_s3 + $0x170] sm:$0xff] }
  0x51   :  { %2483 = vmatpush1.bf16.msra.mxu0 %v2482_v14  ;;  %651 = vmatprep.mubr.f32.mxu0 %v2813_v7  ;;  %v2175_v14 = vld [vmem:[%s3988_s3 + $0x178] sm:$0xff] }
  0x52   :  { %2574 = vmatprep.subr.bf16.mxu0 %v2814_v22  ;;  %2504 = vmatpush1.bf16.msra.mxu1 %v2503_v61  ;;  %v2183_v61 = vld [vmem:[%s3988_s3 + $0x1b8] sm:$0xff] }
  0x53   :  { %2505 = vmatprep.subr.bf16.mxu1 %v2814_v22 }
  0x54   :  { %2154 = vmatmul.mubr.msk.f32.vlgmr.msra.gmra.mrb[0].mxu0 %vm46_vm1, %v554_v15  ;;  %v689_v15 = vrot.slane %v684_v10, %v688_v6  ;;  %v2524_v10 = vpack.c.bf16 %v2185_v9, %v2184_v8 }
  0x55   :  { %657 = vmatprep.mubr.f32.mxu0 %v2813_v7  ;;  %2576 = vmatpush1.bf16.msra.mxu0 %v2575_v23  ;;  %v2176_v23 = vld [vmem:[%s3988_s3 + $0x180] sm:$0xff] }
  0x56   :  { %2577 = vmatprep.subr.bf16.mxu0 %v2814_v22  ;;  %2507 = vmatpush1.bf16.msra.mxu1 %v2506_v5  ;;  %v2512_v27 = vpack.c.bf16 %v2177_v24, %v2176_v23 }
  0x57   :  { %2508 = vmatprep.subr.bf16.mxu1 %v2814_v22 }
  0x58   :  { %2155 = vmatmul.mubr.msk.f32.gmra.mrb[2].mxu0 %vm46_vm1, %v555_v16  ;;  %v2509_v16 = vpack.c.bf16 %v2175_v14, %v2174_v13 }
  0x59   :  { %663 = vmatprep.mubr.f32.mxu0 %v2813_v7  ;;  %2579 = vmatpush1.bf16.msra.mxu0 %v2578_v30 }
  0x5a   :  { %2580 = vmatprep.subr.bf16.mxu0 %v2814_v22  ;;  %2510 = vmatpush1.bf16.msra.mxu1 %v2509_v16  ;;  %v2187_v16 = vld [vmem:[%s3988_s3 + $0x1d8] sm:$0xff] }
  0x5b   :  { %2511 = vmatprep.subr.bf16.mxu1 %v2814_v22 }
  0x5c   :  { %2156 = vmatmul.mubr.msk.f32.gmra.mrb[4].mxu0 %vm46_vm1, %v556_v17  ;;  %v2210_v17 = vld [vmem:[%s3988_s3 + $0x270] sm:$0xff] }
  0x5d   :  { %669 = vmatprep.mubr.f32.mxu0 %v2813_v7  ;;  %2582 = vmatpush1.bf16.msra.mxu0 %v2581_v36  ;;  %v2178_v36 = vld [vmem:[%s3988_s3 + $0x190] sm:$0xff] }
  0x5e   :  { %2583 = vmatprep.subr.bf16.mxu0 %v2814_v22  ;;  %2513 = vmatpush1.bf16.msra.mxu1 %v2512_v27  ;;  %v2515_v38 = vpack.c.bf16 %v2179_v37, %v2178_v36 }
  0x5f   :  { %2514 = vmatprep.subr.bf16.mxu1 %v2814_v22 }
  0x60   :  { %2157 = vmatmul.mubr.msk.f32.gmra.mrb[6].mxu0 %vm46_vm1, %v557_v18  ;;  %v2211_v18 = vld [vmem:[%s3988_s3 + $0x278] sm:$0xff] }
  0x61   :  { %2585 = vmatpush1.bf16.msra.mxu0 %v2584_v42  ;;  %v2602_v19 = vpack.c.bf16 %v2211_v18, %v2210_v17 }
  0x62   :  { %2586 = vmatprep.subr.bf16.mxu0 %v2814_v22  ;;  %2516 = vmatpush1.bf16.msra.mxu1 %v2515_v38 }
  0x63   :  { %2517 = vmatprep.subr.bf16.mxu1 %v2814_v22 }
  0x65   :  { %2588 = vmatpush1.bf16.msra.mxu0 %v2587_v48  ;;  %v2180_v48 = vld [vmem:[%s3988_s3 + $0x1a0] sm:$0xff] }
  0x66   :  { %2589 = vmatprep.subr.bf16.mxu0 %v2814_v22  ;;  %v2518_v51 = vpack.c.bf16 %v2181_v49, %v2180_v48 }
  0x68   :  { %2519 = vmatpush1.bf16.msra.mxu1 %v2518_v51 }
  0x69   :  { %2591 = vmatpush1.bf16.msra.mxu0 %v2590_v54  ;;  %2520 = vmatprep.subr.bf16.mxu1 %v2814_v22 }
  0x6a   :  { %2592 = vmatprep.subr.bf16.mxu0 %v2814_v22 }
  0x6d   :  { %2594 = vmatpush1.bf16.msra.mxu0 %v2593_v60  ;;  %v2182_v60 = vld [vmem:[%s3988_s3 + $0x1b0] sm:$0xff] }
  0x6e   :  { %2595 = vmatprep.subr.bf16.mxu0 %v2814_v22  ;;  %v2521_v1 = vpack.c.bf16 %v2183_v61, %v2182_v60 }
  0x70   :  { %2522 = vmatpush1.bf16.msra.mxu1 %v2521_v1 }
  0x71   :  { %2597 = vmatpush1.bf16.msra.mxu0 %v2596_v2  ;;  %v2218_v2 = vld [vmem:[%s3988_s3 + $0x2b0] sm:$0xff]  ;;  %2523 = vmatprep.subr.bf16.mxu1 %v2814_v22 }
  0x72   :  { %2598 = vmatprep.subr.bf16.mxu0 %v2814_v22  ;;  %v2614_v6 = vpack.c.bf16 %v2219_v3, %v2218_v2 }
  0x74   :  { %2525 = vmatpush1.bf16.msra.mxu1 %v2524_v10 }
  0x75   :  { %2600 = vmatpush1.bf16.msra.mxu0 %v2599_v11  ;;  %v2220_v11 = vld [vmem:[%s3988_s3 + $0x2c0] sm:$0xff]  ;;  %2526 = vmatprep.subr.bf16.mxu1 %v2814_v22 }
  0x76   :  { %2601 = vmatprep.subr.bf16.mxu0 %v2814_v22  ;;  %v2617_v14 = vpack.c.bf16 %v2221_v12, %v2220_v11 }
  0x79   :  { %2603 = vmatpush1.bf16.msra.mxu0 %v2602_v19  ;;  %v2816_v19 = vmov 1966171168  }
  0x7a   :  { %2604 = vmatprep.subr.bf16.mxu0 %v2814_v22 }
  0x7d   :  { %2606 = vmatpush1.bf16.msra.mxu0 %v2605_v32 }
  0x7e   :  { %2607 = vmatprep.subr.bf16.mxu0 %v2814_v22 }
  0x81   :  { %2609 = vmatpush1.bf16.msra.mxu0 %v2608_v44 }
  0x82   :  { %2610 = vmatprep.subr.bf16.mxu0 %v2814_v22 }
  0x85   :  { %2612 = vmatpush1.bf16.msra.mxu0 %v2611_v56 }
  0x86   :  { %2613 = vmatprep.subr.bf16.mxu0 %v2814_v22 }
  0x89   :  { %2615 = vmatpush1.bf16.msra.mxu0 %v2614_v6 }
  0x8a   :  { %2616 = vmatprep.subr.bf16.mxu0 %v2814_v22 }
  0x8d   :  { %2618 = vmatpush1.bf16.msra.mxu0 %v2617_v14 }
  0x8e   :  { %2664 = vmatprep.subr.bf16.mxu0 %v2814_v22 }
 0x127   :  { %v653_v21 = vpop.f32.mrb[0].mxu0 }
 0x128   :  { %v3315_v25 = vadd.f32 %v689_v15, %v653_v21  ;;  %v655_v26 = vpop.f32.mrb[1].mxu0 }
 0x129   :  { %v3326_v31 = vadd.f32 %v3306_v20, %v655_v26 }
 0x12a   :  { %v704_v30 = vmax.f32 %v3315_v25, 0.0 }
 0x12b   :  { %v659_v33 = vpop.f32.mrb[2].mxu0  ;;  %v705_v41 = vmax.f32 %v3326_v31, 0.0 }
 0x12c   :  { %v3329_v34 = vadd.f32 %v689_v15, %v659_v33  ;;  %720 = vrot.lane.b32.xlu0 %v704_v30, %s2815_s11  ;;  %v661_v35 = vpop.f32.mrb[3].mxu0 }
 0x12d   :  { %v3350_v43 = vadd.f32 %v3306_v20, %v661_v35 }
 0x12e   :  { %v706_v42 = vmax.f32 %v3329_v34, 0.0 }
 0x12f   :  { %v665_v45 = vpop.f32.mrb[4].mxu0  ;;  %v707_v54 = vmax.f32 %v3350_v43, 0.0 }
 0x130   :  { %v3352_v46 = vadd.f32 %v689_v15, %v665_v45  ;;  %722 = vrot.lane.b32.xlu0 %v705_v41, %s2815_s11  ;;  %724 = vrot.lane.b32.xlu1 %v706_v42, %s2815_s11  ;;  %v667_v47 = vpop.f32.mrb[5].mxu0 }
 0x131   :  { %v3367_v50 = vadd.f32 %v3306_v20, %v667_v47 }
 0x132   :  { %v708_v55 = vmax.f32 %v3352_v46, 0.0 }
 0x133   :  { %v671_v57 = vpop.f32.mrb[6].mxu0  ;;  %v709_v0 = vmax.f32 %v3367_v50, 0.0 }
 0x134   :  { %v3379_v58 = vadd.f32 %v689_v15, %v671_v57  ;;  %726 = vrot.lane.b32.xlu1 %v707_v54, %s2815_s11  ;;  %728 = vrot.lane.b32.xlu0 %v708_v55, %s2815_s11  ;;  %v673_v59 = vpop.f32.mrb[7].mxu0  ;;  %v2186_v15 = vld [vmem:[%s3988_s3 + $0x1d0] sm:$0xff] }
 0x135   :  { %v3403_v5 = vadd.f32 %v3306_v20, %v673_v59  ;;  %v2527_v17 = vpack.c.bf16 %v2187_v16, %v2186_v15  ;;  %v779_v20 = vunpack.c.l.s4 %v2816_v19 }
 0x136   :  { %v710_v4 = vmax.f32 %v3379_v58, 0.0 }
 0x137   :  { %v711_v13 = vmax.f32 %v3403_v5, 0.0  ;;  %2528 = vmatpush1.bf16.msra.mxu1 %v2527_v17  ;;  %v780_v27 = vunpack.c.0.s8 %v779_v20 }
 0x138   :  { %730 = vrot.lane.b32.xlu1 %v709_v0, %s2815_s11  ;;  %732 = vrot.lane.b32.xlu0 %v710_v4, %s2815_s11 }
 0x139   :  { %2529 = vmatprep.subr.bf16.mxu1 %v2814_v22  ;;  %v3450_v38 = vsub.s32 %v780_v27, %v3266_v63  ;;  %v2256_v27 = vld [vmem:[%s3988_s3 + $0x3c0] sm:$0xff] }
 0x13c   :  { %734 = vrot.lane.b32.xlu1 %v711_v13, %s2815_s11 }
 0x19e   :  { %v721_v18 = vpop.permute.xlu0 %720 }
 0x1a2   :  { %v723_v21 = vpop.permute.xlu0 %722  ;;  %v725_v23 = vpop.permute.xlu1 %724 }
 0x1a3   :  { %v737_v24 = vsel %vm736_vm4, %v721_v18, %v723_v21  ;;  %v750_v26 = vmax.f32 %v705_v41, %v723_v21 }
 0x1a4   :  { %v749_v28 = vmax.f32 %v704_v30, %v737_v24 }
 0x1a5   :  { %v762_v29 = vrot.slane %v750_v26, 1 }
 0x1a6   :  { %v761_v32 = vrot.slane %v749_v28, 1  ;;  %v727_v33 = vpop.permute.xlu1 %726  ;;  %v729_v40 = vpop.permute.xlu0 %728 }
 0x1a7   :  { %v770_v35 = vmax.f32 %v750_v26, %v762_v29  ;;  %v738_v36 = vsel %vm736_vm4, %v725_v23, %v727_v33  ;;  %v752_v37 = vmax.f32 %v707_v54, %v727_v33  ;;  %v1055_v29 = vld [vmem:[#allocation3 + $0x8] sm:$0x80] }
 0x1a8   :  { %v769_v39 = vmax.f32 %v749_v28, %v761_v32  ;;  %v751_v31 = vmax.f32 %v706_v42, %v738_v36  ;;  %v2257_v28 = vld [vmem:[%s3988_s3 + $0x3c8] sm:$0xff]  ;;  %v1054_v32 = vld [vmem:[#allocation3] sm:$0x80] }
 0x1a9   :  { %v882_v41 = vrot.slane %v752_v37, 1  ;;  %v1024_v36 = vld [vmem:[%s3988_s3] sm:$0xff] }
 0x1aa   :  { %v777_v25 = vcombine.low %v769_v39, %v770_v35  ;;  %v829_v30 = vcombine.high %v769_v39, %v770_v35  ;;  %v881_v44 = vrot.slane %v751_v31, 1  ;;  %v731_v45 = vpop.permute.xlu1 %730  ;;  %v733_v57 = vpop.permute.xlu0 %732  ;;  %v1074_v39 = vrot.slane %v1055_v29, 7 }
 0x1ab   :  { %v890_v47 = vmax.f32 %v752_v37, %v882_v41  ;;  %v739_v48 = vsel %vm736_vm4, %v729_v40, %v731_v45  ;;  %v754_v43 = vmax.f32 %v709_v0, %v731_v45  ;;  %v2665_v37 = vpack.c.bf16 %v2257_v28, %v2256_v27  ;;  %v2258_v40 = vld [vmem:[%s3988_s3 + $0x3d0] sm:$0xff]  ;;  %v2259_v41 = vld [vmem:[%s3988_s3 + $0x3d8] sm:$0xff] }
 0x1ac   :  { %v784_v49 = vrot.slane %v777_v25, %v3450_v38  ;;  %v836_v63 = vrot.slane %v829_v30, %v3450_v38  ;;  %v889_v51 = vmax.f32 %v751_v31, %v881_v44  ;;  %v753_v34 = vmax.f32 %v708_v55, %v739_v48  ;;  %v1025_v31 = vld [vmem:[%s3988_s3 + $0x8] sm:$0xff] }
 0x1ad   :  { %v764_v52 = vrot.slane %v754_v43, 1 }
 0x1ae   :  { %v791_v53 = vrot.slane %v784_v49, %v3450_v38  ;;  %v843_v54 = vrot.slane %v836_v63, %v3450_v38  ;;  %v897_v50 = vcombine.low %v889_v51, %v890_v47  ;;  %v945_v56 = vcombine.high %v889_v51, %v890_v47  ;;  %v735_v59 = vpop.permute.xlu1 %734 }
 0x1af   :  { %v763_v60 = vrot.slane %v753_v34, 1  ;;  %v772_v61 = vmax.f32 %v754_v43, %v764_v52  ;;  %v740_v0 = vsel %vm736_vm4, %v733_v57, %v735_v59  ;;  %v756_v46 = vmax.f32 %v711_v13, %v735_v59  ;;  %v1026_v52 = vld [vmem:[%s3988_s3 + $0x10] sm:$0xff]  ;;  %v2261_v57 = vld [vmem:[%s3988_s3 + $0x3e8] sm:$0xff]  ;;  %v1059_v59 = vld [vmem:[#allocation3 + $0x38] sm:$0x80] }
 0x1b0   :  { %814 = vst.msk [vmem:[#allocation3 + $0x10] ss:$8 sm:$0x3] %vm3462_vm5, %v791_v53  ;;  %v819_v62 = vcombine.high %v791_v53, %v791_v53  ;;  %862 = vst.msk [vmem:[#allocation3 + $0x12] ss:$8 sm:$0x3] %vm3462_vm5, %v843_v54  ;;  %v867_v55 = vcombine.high %v843_v54, %v843_v54  ;;  %v904_v1 = vrot.slane %v897_v50, %v3450_v38 }
 0x1b1   :  { %v952_v2 = vrot.slane %v945_v56, %v3450_v38  ;;  %v771_v3 = vmax.f32 %v753_v34, %v763_v60  ;;  %v755_v5 = vmax.f32 %v710_v4, %v740_v0  ;;  %v884_v6 = vrot.slane %v756_v46, 1  ;;  %v1027_v53 = vld [vmem:[%s3988_s3 + $0x18] sm:$0xff]  ;;  %v1538_v50 = vld [vmem:[#allocation3 + $0x28] sm:$0x3]  ;;  %v2260_v56 = vld [vmem:[%s3988_s3 + $0x3e0] sm:$0xff] }
 0x1b2   :  { %824 = vst.msk [vmem:[#allocation3 + $0x11] ss:$8 sm:$0x3] %vm3462_vm5, %v819_v62  ;;  %872 = vst.msk [vmem:[#allocation3 + $0x13] ss:$8 sm:$0x3] %vm3462_vm5, %v867_v55  ;;  %v911_v8 = vrot.slane %v904_v1, %v3450_v38  ;;  %v2530_v63 = vpack.c.bf16 %v1025_v31, %v1024_v36  ;;  %v2668_v34 = vpack.c.bf16 %v2259_v41, %v2258_v40 }
 0x1b3   :  { %v959_v9 = vrot.slane %v952_v2, %v3450_v38  ;;  %v792_v10 = vcombine.low %v771_v3, %v772_v61  ;;  %v844_v11 = vcombine.high %v771_v3, %v772_v61  ;;  %v883_v12 = vrot.slane %v755_v5, 1  ;;  %v1058_v61 = vld [vmem:[#allocation3 + $0x30] sm:$0x80]  ;;  %v994_v0 = vld [vmem:[#allocation3 + $0x8] sm:$0xc0]  ;;  %v1028_v55 = vld [vmem:[%s3988_s3 + $0x20] sm:$0xff] }
 0x1b4   :  { %v892_v13 = vmax.f32 %v756_v46, %v884_v6  ;;  %930 = vst.msk [vmem:[#allocation3 + $0x14] ss:$8 sm:$0x3] %vm3462_vm5, %v911_v8  ;;  %v935_v58 = vcombine.high %v911_v8, %v911_v8  ;;  %v1071_v47 = vrot.slane %v1054_v32, 7  ;;  %v2533_v60 = vpack.c.bf16 %v1027_v53, %v1026_v52  ;;  %v2262_v6 = vld [vmem:[%s3988_s3 + $0x3f0] sm:$0xff]  ;;  %v2263_v8 = vld [vmem:[%s3988_s3 + $0x3f8] sm:$0xff] }
 0x1b5   :  { %978 = vst.msk [vmem:[#allocation3 + $0x16] ss:$8 sm:$0x3] %vm3462_vm5, %v959_v9  ;;  %v983_v4 = vcombine.high %v959_v9, %v959_v9  ;;  %v799_v14 = vrot.slane %v792_v10, %v3450_v38  ;;  %v851_v15 = vrot.slane %v844_v11, %v3450_v38  ;;  %v891_v16 = vmax.f32 %v755_v5, %v883_v12  ;;  %v1029_v5 = vld [vmem:[%s3988_s3 + $0x28] sm:$0xff]  ;;  %v1032_v32 = vld [vmem:[%s3988_s3 + $0x40] sm:$0xff]  ;;  %v2267_v36 = vld [vmem:[%s3988_s3 + $0x418] sm:$0xff] }
 0x1b6   :  { %940 = vst.msk [vmem:[#allocation3 + $0x15] ss:$8 sm:$0x3] %vm3462_vm5, %v935_v58  ;;  %v1556_v62 = vrot.slane %v1538_v50, 2  ;;  %v2671_v2 = vpack.c.bf16 %v2261_v57, %v2260_v56  ;;  %v1080_v3 = vrot.slane %v1059_v59, 7  ;;  %v1077_v12 = vrot.slane %v1058_v61, 7 }
 0x1b7   :  { %988 = vst.msk [vmem:[#allocation3 + $0x17] ss:$8 sm:$0x3] %vm3462_vm5, %v983_v4  ;;  %v806_v17 = vrot.slane %v799_v14, %v3450_v38  ;;  %v858_v18 = vrot.slane %v851_v15, %v3450_v38  ;;  %v912_v19 = vcombine.low %v891_v16, %v892_v13  ;;  %v960_v20 = vcombine.high %v891_v16, %v892_v13  ;;  %v1034_v31 = vld [vmem:[%s3988_s3 + $0x50] sm:$0xff]  ;;  %v1035_v40 = vld [vmem:[%s3988_s3 + $0x58] sm:$0xff]  ;;  %v2268_v41 = vld [vmem:[%s3988_s3 + $0x420] sm:$0xff] }
 0x1b8   :  { %v1013_v4 = vrot.slane %v994_v0, 6  ;;  %v2273_v52 = vld [vmem:[%s3988_s3 + $0x448] sm:$0xff]  ;;  %v2274_v56 = vld [vmem:[%s3988_s3 + $0x450] sm:$0xff]  ;;  %v2275_v57 = vld [vmem:[%s3988_s3 + $0x458] sm:$0xff] }
 0x1b9   :  { %817 = vst.msk [vmem:[#allocation3 + $0x40] ss:$8 sm:$0x3] %vm3462_vm5, %v806_v17  ;;  %v820_v21 = vcombine.high %v806_v17, %v806_v17  ;;  %865 = vst.msk [vmem:[#allocation3 + $0x42] ss:$8 sm:$0x3] %vm3462_vm5, %v858_v18  ;;  %v868_v23 = vcombine.high %v858_v18, %v858_v18  ;;  %v919_v24 = vrot.slane %v912_v19, %v3450_v38 }
 0x1ba   :  { %v967_v26 = vrot.slane %v960_v20, %v3450_v38  ;;  %v2536_v17 = vpack.c.bf16 %v1029_v5, %v1028_v55  ;;  %v2674_v19 = vpack.c.bf16 %v2263_v8, %v2262_v6  ;;  %v1030_v20 = vld [vmem:[%s3988_s3 + $0x30] sm:$0xff]  ;;  %v1041_v50 = vld [vmem:[%s3988_s3 + $0x88] sm:$0xff]  ;;  %v1043_v0 = vld [vmem:[%s3988_s3 + $0x98] sm:$0xff] }
 0x1bb   :  { %827 = vst.msk [vmem:[#allocation3 + $0x41] ss:$8 sm:$0x3] %vm3462_vm5, %v820_v21  ;;  %875 = vst.msk [vmem:[#allocation3 + $0x43] ss:$8 sm:$0x3] %vm3462_vm5, %v868_v23  ;;  %v926_v33 = vrot.slane %v919_v24, %v3450_v38 }
 0x1bc   :  { %v974_v35 = vrot.slane %v967_v26, %v3450_v38  ;;  %v1031_v21 = vld [vmem:[%s3988_s3 + $0x38] sm:$0xff]  ;;  %v2264_v24 = vld [vmem:[%s3988_s3 + $0x400] sm:$0xff]  ;;  %v2265_v26 = vld [vmem:[%s3988_s3 + $0x408] sm:$0xff] }
 0x1bd   :  { %933 = vst.msk [vmem:[#allocation3 + $0x44] ss:$8 sm:$0x3] %vm3462_vm5, %v926_v33  ;;  %v936_v38 = vcombine.high %v926_v33, %v926_v33  ;;  %v1057_v45 = vld [vmem:[#allocation3 + $0x18] sm:$0x7f]  ;;  %v2539_v28 = vpack.c.bf16 %v1031_v21, %v1030_v20  ;;  %v2677_v29 = vpack.c.bf16 %v2265_v26, %v2264_v24  ;;  %v1033_v33 = vld [vmem:[%s3988_s3 + $0x48] sm:$0xff] }
 0x1be   :  { %981 = vst.msk [vmem:[#allocation3 + $0x46] ss:$8 sm:$0x3] %vm3462_vm5, %v974_v35  ;;  %v984_v25 = vcombine.high %v974_v35, %v974_v35  ;;  %v1275_v30 = vld [vmem:[#allocation3 + $0x18] sm:$0xff]  ;;  %v1274_v44 = vld [vmem:[#allocation3 + $0x10] sm:$0xff]  ;;  %v1075_v48 = vrot.slane %v1057_v45, 7 }
 0x1bf   :  { %2222 = vmatprep.mubr.msk.f32.mxu0 %vm736_vm4, %v1275_v30  ;;  %v1056_v43 = vld [vmem:[#allocation3 + $0x10] sm:$0x7f]  ;;  %943 = vst.msk [vmem:[#allocation3 + $0x45] ss:$8 sm:$0x3] %vm3462_vm5, %v936_v38  ;;  %v2269_v38 = vld [vmem:[%s3988_s3 + $0x428] sm:$0xff] }
 0x1c0   :  { %991 = vst.msk [vmem:[#allocation3 + $0x47] ss:$8 sm:$0x3] %vm3462_vm5, %v984_v25  ;;  %1380 = vmatmul.mubr.f32.vlgmr.msra.gmra.mrb[8].mxu0 %v1274_v44  ;;  %v1072_v49 = vrot.slane %v1056_v43, 7  ;;  %v1076_v51 = vsel %vm1070_vm6, %v1074_v39, %v1075_v48  ;;  %v1536_v54 = vld [vmem:[#allocation3 + $0x18] sm:$0xfc]  ;;  %v2545_v25 = vpack.c.bf16 %v1035_v40, %v1034_v31  ;;  %v2683_v30 = vpack.c.bf16 %v2269_v38, %v2268_v41 }
 0x1c1   :  { %2666 = vmatpush1.bf16.msra.mxu0 %v2665_v37  ;;  %2188 = vmatprep.mubr.msk.f32.mxu1 %vm736_vm4, %v1076_v51  ;;  %v1555_v46 = vrot.slane %v1536_v54, 2  ;;  %v996_v1 = vld [vmem:[#allocation3 + $0x18] sm:$0x3f]  ;;  %v2266_v35 = vld [vmem:[%s3988_s3 + $0x410] sm:$0xff]  ;;  %v2542_v37 = vpack.c.bf16 %v1033_v33, %v1032_v32  ;;  %v1036_v44 = vld [vmem:[%s3988_s3 + $0x60] sm:$0xff] }
 0x1c2   :  { %v1073_v42 = vsel %vm1070_vm6, %v1071_v47, %v1072_v49  ;;  %2667 = vmatprep.subr.bf16.mxu0 %v2814_v22  ;;  %v1014_v14 = vrot.slane %v996_v1, 6  ;;  %v2680_v39 = vpack.c.bf16 %v2267_v36, %v2266_v35  ;;  %v1037_v45 = vld [vmem:[%s3988_s3 + $0x68] sm:$0xff]  ;;  %v2270_v47 = vld [vmem:[%s3988_s3 + $0x430] sm:$0xff]  ;;  %v2271_v48 = vld [vmem:[%s3988_s3 + $0x438] sm:$0xff] }
 0x1c3   :  { %1185 = vmatmul.mubr.f32.vlgmr.msra.gmra.mrb[0].mxu1 %v1073_v42  ;;  %v1557_v15 = vsel %vm1551_vm7, %v1555_v46, %v1556_v62  ;;  %v2548_v43 = vpack.c.bf16 %v1037_v45, %v1036_v44  ;;  %v2686_v49 = vpack.c.bf16 %v2271_v48, %v2270_v47  ;;  %v1039_v51 = vld [vmem:[%s3988_s3 + $0x78] sm:$0xff]  ;;  %v1040_v54 = vld [vmem:[%s3988_s3 + $0x80] sm:$0xff]  ;;  %v1042_v61 = vld [vmem:[%s3988_s3 + $0x90] sm:$0xff] }
 0x1c4   :  { %2531 = vmatpush1.bf16.msra.mxu1 %v2530_v63  ;;  %v1015_v27 = vsel %vm1009_vm8, %v1013_v4, %v1014_v14  ;;  %v1038_v63 = vld [vmem:[%s3988_s3 + $0x70] sm:$0xff]  ;;  %v2554_v59 = vpack.c.bf16 %v1041_v50, %v1040_v54  ;;  %v2276_v46 = vld [vmem:[%s3988_s3 + $0x460] sm:$0xff]  ;;  %v2277_v62 = vld [vmem:[%s3988_s3 + $0x468] sm:$0xff]  ;;  %v2557_v55 = vpack.c.bf16 %v1043_v0, %v1042_v61 }
 0x1c5   :  { %2669 = vmatpush1.bf16.msra.mxu0 %v2668_v34  ;;  %2532 = vmatprep.subr.bf16.mxu1 %v2814_v22  ;;  %v2272_v34 = vld [vmem:[%s3988_s3 + $0x440] sm:$0xff]  ;;  %v2551_v53 = vpack.c.bf16 %v1039_v51, %v1038_v63  ;;  %v2695_v1 = vpack.c.bf16 %v2277_v62, %v2276_v46  ;;  %v2278_v5 = vld [vmem:[%s3988_s3 + $0x470] sm:$0xff]  ;;  %v2279_v6 = vld [vmem:[%s3988_s3 + $0x478] sm:$0xff] }
 0x1c6   :  { %2670 = vmatprep.subr.bf16.mxu0 %v2814_v22  ;;  %v1061_v11 = vld [vmem:[#allocation3 + $0x48] sm:$0x7f]  ;;  %v1060_v58 = vld [vmem:[#allocation3 + $0x40] sm:$0x7f]  ;;  %v2689_v42 = vpack.c.bf16 %v2273_v52, %v2272_v34  ;;  %v1050_v20 = vld [vmem:[%s3988_s3 + $0xd0] sm:$0xff] }
 0x1c7   :  { %v1277_v9 = vld [vmem:[#allocation3 + $0x48] sm:$0xff]  ;;  %v1276_v10 = vld [vmem:[#allocation3 + $0x40] sm:$0xff]  ;;  %v1081_v13 = vrot.slane %v1061_v11, 7  ;;  %v1078_v16 = vrot.slane %v1060_v58, 7  ;;  %v1047_v11 = vld [vmem:[%s3988_s3 + $0xb8] sm:$0xff] }
 0x1c8   :  { %2534 = vmatpush1.bf16.msra.mxu1 %v2533_v60  ;;  %2223 = vmatprep.mubr.msk.f32.mxu0 %vm736_vm4, %v1277_v9  ;;  %v2692_v60 = vpack.c.bf16 %v2275_v57, %v2274_v56  ;;  %v2698_v9 = vpack.c.bf16 %v2279_v6, %v2278_v5  ;;  %v1048_v14 = vld [vmem:[%s3988_s3 + $0xc0] sm:$0xff]  ;;  %v1051_v21 = vld [vmem:[%s3988_s3 + $0xd8] sm:$0xff]  ;;  %v2285_v24 = vld [vmem:[%s3988_s3 + $0x4a8] sm:$0xff] }
 0x1c9   :  { %1385 = vmatmul.mubr.f32.gmra.mrb[10].mxu0 %v1276_v10  ;;  %2535 = vmatprep.subr.bf16.mxu1 %v2814_v22  ;;  %v1082_v18 = vsel %vm1070_vm6, %v1080_v3, %v1081_v13  ;;  %v1079_v23 = vsel %vm1070_vm6, %v1077_v12, %v1078_v16  ;;  %v1045_v3 = vld [vmem:[%s3988_s3 + $0xa8] sm:$0xff]  ;;  %v1046_v10 = vld [vmem:[%s3988_s3 + $0xb0] sm:$0xff]  ;;  %v2280_v12 = vld [vmem:[%s3988_s3 + $0x480] sm:$0xff]  ;;  %v2569_v26 = vpack.c.bf16 %v1051_v21, %v1050_v20 }
 0x1ca   :  { %2672 = vmatpush1.bf16.msra.mxu0 %v2671_v2  ;;  %2286 = vmatprep.mubr.msk.f32.mxu0 %vm736_vm4, %v1557_v15  ;;  %v1044_v2 = vld [vmem:[%s3988_s3 + $0xa0] sm:$0xff]  ;;  %v2281_v13 = vld [vmem:[%s3988_s3 + $0x488] sm:$0xff]  ;;  %v2563_v58 = vpack.c.bf16 %v1047_v11, %v1046_v10  ;;  %v2282_v16 = vld [vmem:[%s3988_s3 + $0x490] sm:$0xff] }
 0x1cb   :  { %2189 = vmatprep.mubr.msk.f32.mxu1 %vm736_vm4, %v1082_v18  ;;  %2673 = vmatprep.subr.bf16.mxu0 %v2814_v22  ;;  %v2560_v8 = vpack.c.bf16 %v1045_v3, %v1044_v2  ;;  %v2701_v4 = vpack.c.bf16 %v2281_v13, %v2280_v12  ;;  %v1049_v15 = vld [vmem:[%s3988_s3 + $0xc8] sm:$0xff]  ;;  %v1052_v33 = vld [vmem:[%s3988_s3 + $0xe0] sm:$0xff]  ;;  %v995_v40 = vld [vmem:[#allocation3 + $0x10] sm:$0x3f] }
 0x1cc   :  { %1190 = vmatmul.mubr.f32.gmra.mrb[2].mxu1 %v1079_v23  ;;  %v2566_v18 = vpack.c.bf16 %v1049_v15, %v1048_v14  ;;  %v2284_v23 = vld [vmem:[%s3988_s3 + $0x4a0] sm:$0xff]  ;;  %v1053_v35 = vld [vmem:[%s3988_s3 + $0xe8] sm:$0xff]  ;;  %v998_v41 = vld [vmem:[#allocation3 + $0x38] sm:$0xc0]  ;;  %v1011_v63 = vrot.slane %v995_v40, 6 }
 0x1cd   :  { %2537 = vmatpush1.bf16.msra.mxu1 %v2536_v17  ;;  %2190 = vmatprep.mubr.msk.f32.mxu1 %vm736_vm4, %v1015_v27  ;;  %v2283_v17 = vld [vmem:[%s3988_s3 + $0x498] sm:$0xff]  ;;  %v1535_v27 = vld [vmem:[#allocation3 + $0x10] sm:$0xfc]  ;;  %v2707_v32 = vpack.c.bf16 %v2285_v24, %v2284_v23  ;;  %v1540_v36 = vld [vmem:[#allocation3 + $0x48] sm:$0xfc]  ;;  %v2572_v38 = vpack.c.bf16 %v1053_v35, %v1052_v33  ;;  %v1019_v34 = vrot.slane %v998_v41, 6 }
 0x1ce   :  { %2675 = vmatpush1.bf16.msra.mxu0 %v2674_v19  ;;  %2538 = vmatprep.subr.bf16.mxu1 %v2814_v22  ;;  %v2704_v19 = vpack.c.bf16 %v2283_v17, %v2282_v16  ;;  %v1000_v44 = vld [vmem:[#allocation3 + $0x48] sm:$0x3f]  ;;  %v1541_v45 = vld [vmem:[#allocation3 + $0x50] sm:$0x3]  ;;  %v2225_v48 = vld [vmem:[%s3988_s3 + $0x2d8] sm:$0xff] }
 0x1cf   :  { %2676 = vmatprep.subr.bf16.mxu0 %v2814_v22  ;;  %v2224_v47 = vld [vmem:[%s3988_s3 + $0x2d0] sm:$0xff]  ;;  %v1020_v52 = vrot.slane %v1000_v44, 6  ;;  %v1559_v57 = vrot.slane %v1541_v45, 2  ;;  %v2226_v61 = vld [vmem:[%s3988_s3 + $0x2e0] sm:$0xff]  ;;  %v2227_v0 = vld [vmem:[%s3988_s3 + $0x2e8] sm:$0xff] }
 0x1d0   :  { %v2620_v50 = vpack.c.bf16 %v2225_v48, %v2224_v47  ;;  %v2623_v6 = vpack.c.bf16 %v2227_v0, %v2226_v61  ;;  %v2230_v13 = vld [vmem:[%s3988_s3 + $0x300] sm:$0xff]  ;;  %v2232_v14 = vld [vmem:[%s3988_s3 + $0x310] sm:$0xff]  ;;  %v2233_v15 = vld [vmem:[%s3988_s3 + $0x318] sm:$0xff] }
 0x1d1   :  { %2540 = vmatpush1.bf16.msra.mxu1 %v2539_v28  ;;  %v1537_v28 = vld [vmem:[#allocation3 + $0x20] sm:$0x3]  ;;  %v2632_v16 = vpack.c.bf16 %v2233_v15, %v2232_v14  ;;  %v2236_v20 = vld [vmem:[%s3988_s3 + $0x330] sm:$0xff]  ;;  %v2237_v21 = vld [vmem:[%s3988_s3 + $0x338] sm:$0xff] }
 0x1d2   :  { %2678 = vmatpush1.bf16.msra.mxu0 %v2677_v29  ;;  %2541 = vmatprep.subr.bf16.mxu1 %v2814_v22  ;;  %v1542_v29 = vld [vmem:[#allocation3 + $0x58] sm:$0x3]  ;;  %v1553_v31 = vrot.slane %v1537_v28, 2  ;;  %v2234_v17 = vld [vmem:[%s3988_s3 + $0x320] sm:$0xff]  ;;  %v2638_v23 = vpack.c.bf16 %v2237_v21, %v2236_v20  ;;  %v2240_v28 = vld [vmem:[%s3988_s3 + $0x350] sm:$0xff] }
 0x1d3   :  { %2679 = vmatprep.subr.bf16.mxu0 %v2814_v22  ;;  %v2238_v24 = vld [vmem:[%s3988_s3 + $0x340] sm:$0xff]  ;;  %v2243_v35 = vld [vmem:[%s3988_s3 + $0x368] sm:$0xff]  ;;  %v2289_v20 = vld [vmem:[%s3990_s5 + $0x30] sm:$0xff] }
 0x1d4   :  { %v2242_v33 = vld [vmem:[%s3988_s3 + $0x360] sm:$0xff]  ;;  %v2247_v41 = vld [vmem:[%s3988_s3 + $0x388] sm:$0xff]  ;;  %v2290_v21 = vld [vmem:[%s3990_s5 + $0x38] sm:$0xff] }
 0x1d5   :  { %2543 = vmatpush1.bf16.msra.mxu1 %v2542_v37  ;;  %v993_v37 = vld [vmem:[#allocation3] sm:$0xc0]  ;;  %v2251_v47 = vld [vmem:[%s3988_s3 + $0x3a8] sm:$0xff] }
 0x1d6   :  { %2681 = vmatpush1.bf16.msra.mxu0 %v2680_v39  ;;  %2544 = vmatprep.subr.bf16.mxu1 %v2814_v22  ;;  %v1552_v39 = vrot.slane %v1535_v27, 2  ;;  %v2246_v40 = vld [vmem:[%s3988_s3 + $0x380] sm:$0xff] }
 0x1d7   :  { %2682 = vmatprep.subr.bf16.mxu0 %v2814_v22  ;;  %v2250_v45 = vld [vmem:[%s3988_s3 + $0x3a0] sm:$0xff] }
 0x1d8   :  { %v1554_v51 = vsel %vm1551_vm7, %v1552_v39, %v1553_v31  ;;  %v2245_v39 = vld [vmem:[%s3988_s3 + $0x378] sm:$0xff]  ;;  %v2659_v48 = vpack.c.bf16 %v2251_v47, %v2250_v45  ;;  %v2293_v45 = vld [vmem:[%s3990_s5 + $0x50] sm:$0xff] }
 0x1d9   :  { %2546 = vmatpush1.bf16.msra.mxu1 %v2545_v25  ;;  %v1561_v25 = vrot.slane %v1540_v36, 2  ;;  %v2647_v36 = vpack.c.bf16 %v2243_v35, %v2242_v33  ;;  %v2291_v33 = vld [vmem:[%s3990_s5 + $0x40] sm:$0xff]  ;;  %v2292_v35 = vld [vmem:[%s3990_s5 + $0x48] sm:$0xff]  ;;  %v2294_v47 = vld [vmem:[%s3990_s5 + $0x58] sm:$0x3] }
 0x1da   :  { %2684 = vmatpush1.bf16.msra.mxu0 %v2683_v30  ;;  %2547 = vmatprep.subr.bf16.mxu1 %v2814_v22  ;;  %v1562_v30 = vrot.slane %v1542_v29, 2  ;;  %v2241_v29 = vld [vmem:[%s3988_s3 + $0x358] sm:$0xff] }
 0x1db   :  { %2685 = vmatprep.subr.bf16.mxu0 %v2814_v22 }
 0x1dc   :  { %v1563_v54 = vsel %vm1551_vm7, %v1561_v25, %v1562_v30  ;;  %v2248_v25 = vld [vmem:[%s3988_s3 + $0x390] sm:$0xff]  ;;  %v2249_v30 = vld [vmem:[%s3988_s3 + $0x398] sm:$0xff] }
 0x1dd   :  { %2549 = vmatpush1.bf16.msra.mxu1 %v2548_v43  ;;  %v1539_v43 = vld [vmem:[#allocation3 + $0x40] sm:$0xfc]  ;;  %v2656_v44 = vpack.c.bf16 %v2249_v30, %v2248_v25 }
 0x1de   :  { %2687 = vmatpush1.bf16.msra.mxu0 %v2686_v49  ;;  %2550 = vmatprep.subr.bf16.mxu1 %v2814_v22  ;;  %v1010_v49 = vrot.slane %v993_v37, 6  ;;  %v1558_v56 = vrot.slane %v1539_v43, 2  ;;  %v2244_v37 = vld [vmem:[%s3988_s3 + $0x370] sm:$0xff] }
 0x1df   :  { %2688 = vmatprep.subr.bf16.mxu0 %v2814_v22  ;;  %v2650_v31 = vpack.c.bf16 %v2245_v39, %v2244_v37  ;;  %v2252_v43 = vld [vmem:[%s3988_s3 + $0x3b0] sm:$0xff]  ;;  %v2713_v37 = vpack.c.bf16 %v2292_v35, %v2291_v33 }
 0x1e0   :  { %v1012_v46 = vsel %vm1009_vm8, %v1010_v49, %v1011_v63  ;;  %v1560_v5 = vsel %vm1551_vm7, %v1558_v56, %v1559_v57  ;;  %v2253_v49 = vld [vmem:[%s3988_s3 + $0x3b8] sm:$0xff]  ;;  %v1392_v63 = vld [vmem:[#allocation3 + $0x10] sm:$0xfe]  ;;  %v1396_v57 = vld [vmem:[#allocation3 + $0x40] sm:$0xfe] }
 0x1e1   :  { %2552 = vmatpush1.bf16.msra.mxu1 %v2551_v53  ;;  %v997_v53 = vld [vmem:[#allocation3 + $0x30] sm:$0xc0]  ;;  %v1415_v61 = vrot.slane %v1396_v57, 1 }
 0x1e2   :  { %2690 = vmatpush1.bf16.msra.mxu0 %v2689_v42  ;;  %2553 = vmatprep.subr.bf16.mxu1 %v2814_v22  ;;  %v999_v42 = vld [vmem:[#allocation3 + $0x40] sm:$0x3f]  ;;  %v1016_v62 = vrot.slane %v997_v53, 6  ;;  %v1399_v53 = vld [vmem:[#allocation3 + $0x58] sm:$0x1]  ;;  %v2301_v39 = vld [vmem:[%s3990_s5 + $0x70] sm:$0xff] }
 0x1e3   :  { %2691 = vmatprep.subr.bf16.mxu0 %v2814_v22  ;;  %v1419_v56 = vrot.slane %v1399_v53, 1 }
 0x1e5   :  { %2555 = vmatpush1.bf16.msra.mxu1 %v2554_v59  ;;  %v1393_v59 = vld [vmem:[#allocation3 + $0x18] sm:$0xfe] }
 0x1e6   :  { %2693 = vmatpush1.bf16.msra.mxu0 %v2692_v60  ;;  %2556 = vmatprep.subr.bf16.mxu1 %v2814_v22  ;;  %v1395_v60 = vld [vmem:[#allocation3 + $0x28] sm:$0x1]  ;;  %v1412_v2 = vrot.slane %v1393_v59, 1  ;;  %v1398_v59 = vld [vmem:[#allocation3 + $0x50] sm:$0x1] }
 0x1e7   :  { %2694 = vmatprep.subr.bf16.mxu0 %v2814_v22  ;;  %v1413_v3 = vrot.slane %v1395_v60, 1  ;;  %v1416_v0 = vrot.slane %v1398_v59, 1 }
 0x1e9   :  { %2558 = vmatpush1.bf16.msra.mxu1 %v2557_v55  ;;  %v1017_v55 = vrot.slane %v999_v42, 6  ;;  %v1414_v11 = vsel %vm1408_vm9, %v1412_v2, %v1413_v3  ;;  %v1409_v42 = vrot.slane %v1392_v63, 1 }
 0x1ea   :  { %2696 = vmatpush1.bf16.msra.mxu0 %v2695_v1  ;;  %2559 = vmatprep.subr.bf16.mxu1 %v2814_v22  ;;  %v1021_v1 = vsel %vm1009_vm8, %v1019_v34, %v1020_v52  ;;  %v2662_v34 = vpack.c.bf16 %v2253_v49, %v2252_v43  ;;  %v1397_v52 = vld [vmem:[#allocation3 + $0x48] sm:$0xfe]  ;;  %v2303_v43 = vld [vmem:[%s3990_s5 + $0x80] sm:$0xff] }
 0x1eb   :  { %2697 = vmatprep.subr.bf16.mxu0 %v2814_v22  ;;  %v1018_v10 = vsel %vm1009_vm8, %v1016_v62, %v1017_v55  ;;  %v1417_v62 = vsel %vm1408_vm9, %v1415_v61, %v1416_v0  ;;  %v2304_v49 = vld [vmem:[%s3990_s5 + $0x88] sm:$0x3]  ;;  %v1707_v0 = vld [vmem:[%s3990_s5] sm:$0xff] }
 0x1ed   :  { %2561 = vmatpush1.bf16.msra.mxu1 %v2560_v8  ;;  %v2228_v8 = vld [vmem:[%s3988_s3 + $0x2f0] sm:$0xff] }
 0x1ee   :  { %2699 = vmatpush1.bf16.msra.mxu0 %v2698_v9  ;;  %2562 = vmatprep.subr.bf16.mxu1 %v2814_v22  ;;  %v2229_v9 = vld [vmem:[%s3988_s3 + $0x2f8] sm:$0xff] }
 0x1ef   :  { %2700 = vmatprep.subr.bf16.mxu0 %v2814_v22  ;;  %v2626_v12 = vpack.c.bf16 %v2229_v9, %v2228_v8 }
 0x1f1   :  { %2564 = vmatpush1.bf16.msra.mxu1 %v2563_v58  ;;  %v2231_v58 = vld [vmem:[%s3988_s3 + $0x308] sm:$0xff] }
 0x1f2   :  { %2702 = vmatpush1.bf16.msra.mxu0 %v2701_v4  ;;  %2565 = vmatprep.subr.bf16.mxu1 %v2814_v22  ;;  %v2629_v4 = vpack.c.bf16 %v2231_v58, %v2230_v13 }
 0x1f3   :  { %2703 = vmatprep.subr.bf16.mxu0 %v2814_v22 }
 0x1f5   :  { %2567 = vmatpush1.bf16.msra.mxu1 %v2566_v18  ;;  %v2235_v18 = vld [vmem:[%s3988_s3 + $0x328] sm:$0xff] }
 0x1f6   :  { %2705 = vmatpush1.bf16.msra.mxu0 %v2704_v19  ;;  %2568 = vmatprep.subr.bf16.mxu1 %v2814_v22  ;;  %v2635_v19 = vpack.c.bf16 %v2235_v18, %v2234_v17 }
 0x1f7   :  { %2706 = vmatprep.subr.bf16.mxu0 %v2814_v22 }
 0x1f9   :  { %2570 = vmatpush1.bf16.msra.mxu1 %v2569_v26  ;;  %v2239_v26 = vld [vmem:[%s3988_s3 + $0x348] sm:$0xff] }
 0x1fa   :  { %2708 = vmatpush1.bf16.msra.mxu0 %v2707_v32  ;;  %2571 = vmatprep.subr.bf16.mxu1 %v2814_v22  ;;  %v2641_v27 = vpack.c.bf16 %v2239_v26, %v2238_v24  ;;  %v2644_v32 = vpack.c.bf16 %v2241_v29, %v2240_v28  ;;  %v2299_v24 = vld [vmem:[%s3990_s5 + $0x60] sm:$0xff]  ;;  %v2300_v26 = vld [vmem:[%s3990_s5 + $0x68] sm:$0xff] }
 0x1fb   :  { %2729 = vmatprep.subr.bf16.mxu0 %v2814_v22 }
 0x1fd   :  { %2573 = vmatpush1.bf16.msra.mxu1 %v2572_v38  ;;  %1666 = vmatmul.mubr.f32.vlgmr.msra.gmra.mrb[12].mxu0 %v1554_v51  ;;  %v2653_v38 = vpack.c.bf16 %v2247_v41, %v2246_v40  ;;  %v1394_v51 = vld [vmem:[#allocation3 + $0x20] sm:$0x1] }
 0x1fe   :  { %2287 = vmatprep.mubr.msk.f32.mxu0 %vm736_vm4, %v1563_v54  ;;  %2619 = vmatprep.subr.bf16.mxu1 %v2814_v22  ;;  %v1410_v54 = vrot.slane %v1394_v51, 1 }
 0x200   :  { %1264 = vmatmul.mubr.f32.vlgmr.msra.gmra.mrb[4].mxu1 %v1012_v46  ;;  %v1411_v60 = vsel %vm1408_vm9, %v1409_v42, %v1410_v54 }
 0x201   :  { %2191 = vmatprep.mubr.msk.f32.mxu1 %vm736_vm4, %v1021_v1  ;;  %2621 = vmatpush1.bf16.msra.mxu1 %v2620_v50  ;;  %v1418_v50 = vrot.slane %v1397_v52, 1  ;;  %v2736_v52 = vpack.c.bf16 %v2304_v49, %v2303_v43 }
 0x202   :  { %1671 = vmatmul.mubr.f32.gmra.mrb[14].mxu0 %v1560_v5  ;;  %2622 = vmatprep.subr.bf16.mxu1 %v2814_v22 }
 0x203   :  { %v1420_v46 = vsel %vm1408_vm9, %v1418_v50, %v1419_v56  ;;  %2386 = vmatprep.mubr.msk.f32.mxu0 %vm2818_vm12, %v2813_v7 }
 0x204   :  { %1269 = vmatmul.mubr.f32.gmra.mrb[6].mxu1 %v1018_v10 }
 0x205   :  { %2624 = vmatpush1.bf16.msra.mxu1 %v2623_v6  ;;  %2254 = vmatprep.mubr.msk.f32.mxu1 %vm736_vm4, %v1414_v11 }
 0x206   :  { %2625 = vmatprep.subr.bf16.mxu1 %v2814_v22 }
 0x209   :  { %2627 = vmatpush1.bf16.msra.mxu1 %v2626_v12 }
 0x20a   :  { %2628 = vmatprep.subr.bf16.mxu1 %v2814_v22 }
 0x20d   :  { %2630 = vmatpush1.bf16.msra.mxu1 %v2629_v4 }
 0x20e   :  { %2631 = vmatprep.subr.bf16.mxu1 %v2814_v22 }
 0x211   :  { %2633 = vmatpush1.bf16.msra.mxu1 %v2632_v16 }
 0x212   :  { %2634 = vmatprep.subr.bf16.mxu1 %v2814_v22 }
 0x215   :  { %2636 = vmatpush1.bf16.msra.mxu1 %v2635_v19 }
 0x216   :  { %2637 = vmatprep.subr.bf16.mxu1 %v2814_v22 }
 0x219   :  { %2639 = vmatpush1.bf16.msra.mxu1 %v2638_v23  ;;  %v2710_v23 = vpack.c.bf16 %v2290_v21, %v2289_v20  ;;  %v2311_v21 = vld [vmem:[%s3990_s5 + $0xb0] sm:$0xff] }
 0x21a   :  { %2640 = vmatprep.subr.bf16.mxu1 %v2814_v22 }
 0x21d   :  { %2642 = vmatpush1.bf16.msra.mxu1 %v2641_v27  ;;  %v2730_v27 = vpack.c.bf16 %v2300_v26, %v2299_v24 }
 0x21e   :  { %2643 = vmatprep.subr.bf16.mxu1 %v2814_v22 }
 0x21f   :  { %2731 = vmatpush3.bf16.msra.mxu0 %v2730_v27 }
 0x220   :  { %2732 = vmatprep.subr.bf16.mxu0 %v2814_v22 }
 0x221   :  { %2645 = vmatpush1.bf16.msra.mxu1 %v2644_v32 }
 0x222   :  { %2646 = vmatprep.subr.bf16.mxu1 %v2814_v22 }
 0x225   :  { %2648 = vmatpush1.bf16.msra.mxu1 %v2647_v36  ;;  %v2288_v36 = vld [vmem:[%s3989_s4] ss:$0 sm:$0xff] }
 0x226   :  { %2649 = vmatprep.subr.bf16.mxu1 %v2814_v22 }
 0x229   :  { %2651 = vmatpush1.bf16.msra.mxu1 %v2650_v31  ;;  %v2302_v31 = vld [vmem:[%s3990_s5 + $0x78] sm:$0xff] }
 0x22a   :  { %2652 = vmatprep.subr.bf16.mxu1 %v2814_v22  ;;  %v2733_v41 = vpack.c.bf16 %v2302_v31, %v2301_v39 }
 0x22c   :  { %2734 = vmatpush3.bf16.msra.mxu0 %v2733_v41 }
 0x22d   :  { %2654 = vmatpush1.bf16.msra.mxu1 %v2653_v38  ;;  %2735 = vmatprep.subr.bf16.mxu0 %v2814_v22 }
 0x22e   :  { %2655 = vmatprep.subr.bf16.mxu1 %v2814_v22 }
 0x230   :  { %2738 = vmatpush3.bf16.msk.msra.mxu0 %vm3900_vm11, %v2736_v52 }
 0x231   :  { %2657 = vmatpush1.bf16.msra.mxu1 %v2656_v44 }
 0x232   :  { %2658 = vmatprep.subr.bf16.mxu1 %v2814_v22 }
 0x235   :  { %2660 = vmatpush1.bf16.msra.mxu1 %v2659_v48  ;;  %v2716_v48 = vpack.c.bf16 %v2294_v47, %v2293_v45 }
 0x236   :  { %2661 = vmatprep.subr.bf16.mxu1 %v2814_v22 }
 0x239   :  { %2663 = vmatpush1.bf16.msra.mxu1 %v2662_v34 }
 0x23a   :  { %2709 = vmatprep.subr.bf16.mxu1 %v2814_v22 }
 0x23c   :  { %1523 = vmatmul.mubr.f32.vlgmr.msra.gmra.mrb[8].mxu1 %v1411_v60 }
 0x23d   :  { %2255 = vmatprep.mubr.msk.f32.mxu1 %vm736_vm4, %v1420_v46  ;;  %2711 = vmatpush3.bf16.msra.mxu1 %v2710_v23  ;;  %v1708_v46 = vld [vmem:[%s3990_s5 + $0x8] sm:$0xff]  ;;  %v2312_v23 = vld [vmem:[%s3990_s5 + $0xb8] sm:$0x3] }
 0x23e   :  { %2712 = vmatprep.subr.bf16.mxu1 %v2814_v22  ;;  %v2746_v24 = vpack.c.bf16 %v2312_v23, %v2311_v21 }
 0x240   :  { %1528 = vmatmul.mubr.f32.gmra.mrb[10].mxu1 %v1417_v62 }
 0x241   :  { %2714 = vmatpush3.bf16.msra.mxu1 %v2713_v37  ;;  %2356 = vmatprep.mubr.msk.f32.mxu1 %vm2818_vm12, %v2813_v7 }
 0x242   :  { %2715 = vmatprep.subr.bf16.mxu1 %v2814_v22 }
 0x245   :  { %2718 = vmatpush3.bf16.msk.msra.mxu1 %vm3900_vm11, %v2716_v48 }
 0x246   :  { %2719 = vmatprep.subr.bf16.mxu1 %v2814_v22 }
 0x293   :  { %v1381_v55 = vpop.f32.mrb[8].mxu0 }
 0x294   :  { %v1383_v1 = vpop.f32.mrb[9].mxu0 }
 0x296   :  { %v1186_v2 = vpop.f32.mrb[0].mxu1 }
 0x297   :  { %v1188_v3 = vpop.f32.mrb[1].mxu1 }
 0x29c   :  { %v1386_v5 = vpop.f32.mrb[10].mxu0 }
 0x29d   :  { %v1388_v6 = vpop.f32.mrb[11].mxu0 }
 0x29e   :  { %v1709_v6 = vld [vmem:[%s3990_s5 + $0x10] sm:$0xff] }
 0x29f   :  { %v1191_v8 = vpop.f32.mrb[2].mxu1 }
 0x2a0   :  { %v1193_v9 = vpop.f32.mrb[3].mxu1 }
 0x2d0   :  { %v1667_v10 = vpop.f32.mrb[12].mxu0 }
 0x2d1   :  { %v1669_v11 = vpop.f32.mrb[13].mxu0 }
 0x2d3   :  { %v1265_v12 = vpop.f32.mrb[4].mxu1 }
 0x2d4   :  { %v1266_v13 = vadd.f32 %v1265_v12, %v1186_v2  ;;  %v1267_v58 = vpop.f32.mrb[5].mxu1  ;;  %v1711_v12 = vld [vmem:[%s3990_s5 + $0x20] sm:$0xff] }
 0x2d5   :  { %v1672_v4 = vpop.f32.mrb[14].mxu0 }
 0x2d6   :  { %v1674_v14 = vpop.f32.mrb[15].mxu0  ;;  %v1390_v15 = vadd.f32 %v1381_v55, %v1266_v13  ;;  %v2720_v55 = vpack.c.bf16 %v1708_v46, %v1707_v0  ;;  %v1712_v13 = vld [vmem:[%s3990_s5 + $0x28] sm:$0x3] }
 0x2d7   :  { %v1270_v16 = vpop.f32.mrb[6].mxu1  ;;  %v2726_v58 = vpack.c.bf16 %v1712_v13, %v1711_v12  ;;  %v2308_v14 = vld [vmem:[%s3990_s5 + $0x98] sm:$0xff] }
 0x2d8   :  { %v1271_v17 = vadd.f32 %v1270_v16, %v1191_v8  ;;  %v1272_v18 = vpop.f32.mrb[7].mxu1  ;;  %v1710_v8 = vld [vmem:[%s3990_s5 + $0x18] sm:$0xff] }
 0x2d9   :  { %v2723_v11 = vpack.c.bf16 %v1710_v8, %v1709_v6  ;;  %v2310_v18 = vld [vmem:[%s3990_s5 + $0xa8] sm:$0xff] }
 0x2da   :  { %v1391_v19 = vadd.f32 %v1386_v5, %v1271_v17  ;;  %v2309_v17 = vld [vmem:[%s3990_s5 + $0xa0] sm:$0xff] }
 0x2db   :  { %v2743_v20 = vpack.c.bf16 %v2310_v18, %v2309_v17 }
 0x30f   :  { %v1524_v28 = vpop.f32.mrb[8].mxu1 }
 0x310   :  { %v1533_v29 = vadd.f32 %v1524_v28, %v1390_v15  ;;  %v1526_v32 = vpop.f32.mrb[9].mxu1 }
 0x312   :  { %v1676_v40 = vadd.f32 %v1667_v10, %v1533_v29 }
 0x313   :  { %v1529_v38 = vpop.f32.mrb[10].mxu1 }
 0x314   :  { %v1534_v25 = vadd.f32 %v1529_v38, %v1391_v19  ;;  %v1531_v30 = vpop.f32.mrb[11].mxu1  ;;  %v1685_v44 = vadd.f32 %v2288_v36, %v1676_v40 }
 0x316   :  { %v1677_v63 = vadd.f32 %v1672_v4, %v1534_v25  ;;  %v1687_v51 = vmax.f32 %v1685_v44, 0.0  ;;  %v2307_v4 = vld [vmem:[%s3990_s5 + $0x90] sm:$0xff] }
 0x317   :  { %v2740_v16 = vpack.c.bf16 %v2308_v14, %v2307_v4 }
 0x318   :  { %1691 = vrot.lane.b32.xlu0 %v1687_v51, %s2819_s19  ;;  %v1686_v53 = vadd.f32 %v2288_v36, %v1677_v63 }
 0x31a   :  { %v1688_v42 = vmax.f32 %v1686_v53, 0.0 }
 0x31c   :  { %1693 = vrot.lane.b32.xlu1 %v1688_v42, %s2819_s19  ;;  %s2789_s19 = scalar_lea.vmem %s2067_s18, 32 }
 0x31d   :  { %p2790_p0 = scmp.ne.s32.totalorder %s2067_s18, %s2789_s19  ;;  %p2795_p2 = scmp.lt.s32.totalorder %s2789_s19, %s2789_s19 }
 0x31f   :  { %p2796_p3 = por %p2795_p2, %p2794_p1 }
 0x321   :  { %p2797_p4 = pnand %p2796_p3, %p2790_p0 }
 0x38a   :  { %v1692_v54 = vpop.permute.xlu0 %1691 }
 0x38b   :  { %v1697_v50 = vmax.f32 %v1687_v51, %v1692_v54 }
 0x38d   :  { %v1701_v56 = vrot.slane %v1697_v50, 1 }
 0x38e   :  { %v1694_v57 = vpop.permute.xlu1 %1693 }
 0x38f   :  { %v1698_v59 = vmax.f32 %v1688_v42, %v1694_v57  ;;  %v1705_v60 = vmax.f32 %v1697_v50, %v1701_v56 }
 0x391   :  { %v1702_v61 = vrot.slane %v1698_v59, 1  ;;  %v1722_v1 = vrot.slane %v1705_v60, 2  ;;  %v1886_v2 = vrot.slane %v1705_v60, 4  ;;  %v1972_v27 = vrot.slane %v1705_v60, 6 }
 0x393   :  { %v1706_v62 = vmax.f32 %v1698_v59, %v1702_v61 }
 0x395   :  { %v1723_v3 = vrot.slane %v1706_v62, 1  ;;  %v1887_v5 = vrot.slane %v1706_v62, 3  ;;  %v1802_v15 = vrot.slane %v1706_v62, 7  ;;  %v1973_v26 = vrot.slane %v1706_v62, 5 }
 0x397   :  { %v1725_v9 = vsel %vm1724_vm13, %v1723_v3, %v1722_v1  ;;  %v1888_v10 = vsel %vm1724_vm13, %v1887_v5, %v1886_v2  ;;  %v1803_v19 = vsel %vm1724_vm13, %v1802_v15, %v1705_v60 }
 0x398   :  { %2357 = vmatmul.mubr.msk.f32.vlgmr.msra.gmra.mrb[12].mxu1 %vm1726_vm14, %v1725_v9  ;;  %2387 = vmatmul.mubr.msk.f32.vlgmr.msra.gmra.mrb[16].mxu0 %vm1726_vm14, %v1888_v10 }
 0x399   :  { %2721 = vmatpush3.bf16.msra.mxu1 %v2720_v55  ;;  %2371 = vmatprep.mubr.msk.f32.mxu1 %vm2818_vm12, %v2813_v7 }
 0x39a   :  { %2722 = vmatprep.subr.bf16.mxu1 %v2814_v22 }
 0x39d   :  { %2724 = vmatpush3.bf16.msra.mxu1 %v2723_v11 }
 0x39e   :  { %2725 = vmatprep.subr.bf16.mxu1 %v2814_v22 }
 0x3a1   :  { %2728 = vmatpush3.bf16.msk.msra.mxu1 %vm3900_vm11, %v2726_v58 }
 0x3a2   :  { %2739 = vmatprep.subr.bf16.mxu1 %v2814_v22 }
 0x3a4   :  { %2372 = vmatmul.mubr.msk.f32.vlgmr.msra.gmra.mrb[14].mxu1 %vm1726_vm14, %v1803_v19 }
 0x3a5   :  { %2741 = vmatpush3.bf16.msra.mxu1 %v2740_v16  ;;  %2401 = vmatprep.mubr.msk.f32.mxu1 %vm2818_vm12, %v2813_v7  ;;  %v1974_v7 = vsel %vm1724_vm13, %v1973_v26, %v1972_v27 }
 0x3a6   :  { %2742 = vmatprep.subr.bf16.mxu1 %v2814_v22 }
 0x3a9   :  { %2744 = vmatpush3.bf16.msra.mxu1 %v2743_v20 }
 0x3aa   :  { %2745 = vmatprep.subr.bf16.mxu1 %v2814_v22  ;;  %v2315_v22 = vld [vmem:[%s3991_s6] ss:$0 sm:$0xff] }
 0x3ad   :  { %2748 = vmatpush3.bf16.msk.msra.mxu1 %vm3900_vm11, %v2746_v24 }
 0x3b0   :  { %2402 = vmatmul.mubr.msk.f32.vlgmr.msra.gmra.mrb[16].mxu1 %vm1726_vm14, %v1974_v7 }
 0x46b   :  { %v1798_v28 = vpop.f32.mrb[12].mxu1  ;;  %v1960_v29 = vpop.f32.mrb[16].mxu0 }
 0x46c   :  { %v2358_v32 = vpop.f32.mrb[13].mxu1  ;;  %v2388_v33 = vpop.f32.mrb[17].mxu0 }
 0x477   :  { %v1875_v35 = vpop.f32.mrb[14].mxu1 }
 0x478   :  { %v1876_v36 = vadd.f32 %v1875_v35, %v1798_v28  ;;  %v2373_v37 = vpop.f32.mrb[15].mxu1 }
 0x47a   :  { %v1964_v39 = vadd.f32 %v1960_v29, %v1876_v36 }
 0x483   :  { %v2046_v31 = vpop.f32.mrb[16].mxu1 }
 0x484   :  { %v2050_v40 = vadd.f32 %v2046_v31, %v1964_v39  ;;  %v2403_v41 = vpop.f32.mrb[17].mxu1 }
 0x486   :  { %v2058_v38 = vadd.f32 %v2315_v22, %v2050_v40 }
 0x488   :  { %2059 = vst [vmem:[#allocation4] sm:$0x3] %v2058_v38 }
 0x489   :  { %2800 = shalt.err (!%p2797_p4)
}
 0x48a   :  { %s2801_s21 = scalar_lea.hbm %s3992_s7, 32 }
 0x48b   :  { %p2802_p5 = scmp.ne.s32.totalorder %s3992_s7, %s2801_s21  ;;  %p2805_p6 = scmp.lt.u32.totalorder %s2801_s21, %s3992_s7 }
 0x48d   :  { %p2807_p7 = pnand %p2805_p6, %p2802_p5 }
 0x48f   :  { %2810 = shalt.err (!%p2807_p7)
}
 0x490   :  { %2069 = dma.vmem_to_hbm [thread:$0]  %s2067_s18, 32, %s3992_s7, [#allocation5]  }
 0x491   :  { %2811 = dma.done.wait [#allocation5], 32  }
 0x492   :  { %2812 = vsyncadd [#allocation5], 4294967264 }
 0x493   :  { %2073 = vsyncpa [#allocation5], 1 }

</bundles_post_ra>
